<compile_context>
chip_gen: v7x
topology: tpu7x:2x2x1
jax: 0.10.0
libtpu: 0.0.40
codegen_flags: <defaults>
</compile_context>

<pallas_src>
import functools

import jax
import jax.numpy as jnp
from jax import lax
from jax.experimental import pallas as pl
from jax.experimental.pallas import tpu as pltpu


def _cost_volume_kernel(disp_ref, xg_ref, xc_ref, y_ref, out_ref,
                        *, num_groups, cg, cc, mxu_dtype):
    # disp_ref: (tH, W)           disparity samples for this (b, d, h-tile)
    # xg_ref:   (tH, Cg, W)       left gwc features, row-major (h-batched)
    # xc_ref:   (Cc, tH, W)       left concat features, channel-major
    # y_ref:    (tH, Cg+Cc, W)    right gwc+concat features, row-major
    # out_ref:  (G + 2*Cc, tH, W) output slab (NCDHW channel-major)
    tH, W = disp_ref.shape
    G = num_groups
    cpg = cg // G

    disp = disp_ref[...]                                              # (tH, W)
    w_pos = lax.broadcasted_iota(jnp.int32, (tH, W), 1).astype(jnp.float32)
    xf = w_pos - disp                                                 # source column
    keep = (w_pos >= disp).astype(jnp.float32)                        # left-feature mask

    # Bilinear (hat) warp weights with implicit zero padding, built directly
    # in canonical rhs layout (source column k on sublanes, dest w on lanes):
    #   wmat[h, k, w] = relu(1 - |xf[h, w] - k|)
    k_iota = lax.broadcasted_iota(jnp.int32, (tH, W, W), 1).astype(jnp.float32)
    wmat = jnp.maximum(0.0, 1.0 - jnp.abs(xf[:, None, :] - k_iota))   # (tH, K, W)

    y = y_ref[...]                                                    # (tH, Cy, W)
    if mxu_dtype is not None:
        # Opt-in low-precision MXU path: cast AFTER the fp32 coordinate math
        # (never compute xf / |xf - k| in bf16); accumulation stays fp32.
        y = y.astype(mxu_dtype)
        wmat = wmat.astype(mxu_dtype)

    # Warp ALL right-image features in one canonical batched MXU matmul
    # (batch over rows h; lhs(M=Cy, K=W) x rhs(K=W, N=W)):
    #   y_warp[h, c, w] = sum_k y[h, c, k] * wmat[h, k, w]
    y_warp = jnp.einsum('hck,hkw->hcw', y, wmat,
                        preferred_element_type=jnp.float32)           # (tH, Cy, W)
    yg_warp = y_warp[:, :cg, :]                                       # (tH, Cg, W)
    yc_warp = y_warp[:, cg:, :]                                       # (tH, Cc, W)

    # ---- gwc branch, computed in row-major layout (no Cg-wide transpose) ----
    prod = xg_ref[...] * yg_warp                                      # (tH, Cg, W)
    # Groupwise channel sum emitted directly in the (G, tH, W) output layout;
    # contiguous per-group slabs avoid sublane-splitting reshapes.
    gwc = jnp.stack(
        [jnp.sum(prod[:, g * cpg:(g + 1) * cpg, :], axis=1) for g in range(G)],
        axis=0)                                                       # (G, tH, W)
    # keep-mask and the 1/cpg mean factored out of the channel sums.
    gwc = gwc * (keep * (1.0 / cpg))[None]

    # ---- concat branch ----
    xc_masked = xc_ref[...] * keep[None]                              # (Cc, tH, W)
    yc_out = pltpu.einshape('hcw->chw', yc_warp)                      # (Cc, tH, W)

    # output channel order: [gwc (G), x_concat_masked (Cc), y_concat_warped (Cc)]
    out_ref[0:G] = gwc.astype(out_ref.dtype)
    out_ref[G:G + cc] = xc_masked.astype(out_ref.dtype)
    out_ref[G + cc:] = yc_out.astype(out_ref.dtype)


def _round_up(x, m):
    return -(-x // m) * m


def _tpu_vmem_capacity_bytes():
    try:
        return int(pltpu.get_tpu_info().vmem_capacity_bytes)
    except Exception:
        return 128 * 1024 * 1024          # v5e/v6e physical; v7x has 64 MiB


def _pick_tile_h(H, W, vmem_cap):
    """Largest H-tile that is a multiple of 8, divides H, and keeps the
    (tH, W, W) fp32 warp-weight matrix within a generation-scaled budget
    (8 MiB on 64-MiB-VMEM v7x, up to 24 MiB on 128-MiB v5e/v6e)."""
    budget = min(max(vmem_cap // 8, 8 * 1024 * 1024), 24 * 1024 * 1024)
    if H % 8 != 0:
        return H                      # full-extent block (wrapper pads H to avoid this)
    tH = 8
    while (tH * 2 <= min(H, 64) and H % (tH * 2) == 0
           and (tH * 2) * W * W * 4 <= budget):
        tH *= 2
    return tH


def get_cost_volume(x_gwc, y_gwc, x_cat, y_cat, disp, num_groups, *,
                    tile_h=None, out_dtype=None, mxu_dtype=None,
                    pad_w_to_lanes=False):
    """Pallas implementation of GetCostVolume.forward.

    x_gwc, y_gwc: (B, Cg, H, W)  left/right gwc features
    x_cat, y_cat: (B, Cc, H, W)  left/right concat features
    disp:         (B, D, H, W)   per-pixel disparity samples
    returns:      (B, num_groups + 2*Cc, D, H, W)

    mxu_dtype=jnp.bfloat16 enables the fast MXU warp (fp32 accumulation,
    ~2^-9 relative weight error). out_dtype=jnp.bfloat16 halves the dominant
    HBM writeback stream (biggest relative win on v5e).
    """
    B, Cg, H, W = x_gwc.shape
    Cc = x_cat.shape[1]
    D = disp.shape[1]
    G = num_groups
    assert Cg % G == 0
    Cy = Cg + Cc
    Ctot = G + 2 * Cc
    if out_dtype is None:
        out_dtype = x_gwc.dtype

    # --- padding ----------------------------------------------------------
    # H padded to a multiple of 8 so the H tile never falls back to the full
    # extent (which would make wmat H*W*W*4 bytes). W padding to a lane
    # multiple (128) makes output stores lane-dense but costs an extra pass
    # over the large 5-D output when slicing the pad off, so it is opt-in.
    Hp = H if H % 8 == 0 else _round_up(H, 8)
    Wp = W
    if pad_w_to_lanes and W % 128 != 0:
        Wp = _round_up(W, 128)
    if (Hp, Wp) != (H, W):
        pad4 = ((0, 0), (0, 0), (0, Hp - H), (0, Wp - W))
        x_gwc = jnp.pad(x_gwc, pad4)
        y_gwc = jnp.pad(y_gwc, pad4)
        x_cat = jnp.pad(x_cat, pad4)
        y_cat = jnp.pad(y_cat, pad4)
        disp = jnp.pad(disp, pad4)

    vmem_cap = _tpu_vmem_capacity_bytes()
    tH = tile_h if tile_h is not None else _pick_tile_h(Hp, Wp, vmem_cap)
    assert Hp % tH == 0 and (tH % 8 == 0 or tH == Hp), (Hp, tH)

    # Right features share the warp-weight matrix -> concatenate so a single
    # MXU contraction covers both branches. Pre-transpose y and x_gwc to
    # row-major (B, H, C, W) once in the wrapper (D-independent) so neither
    # the contraction nor the gwc product needs a Cg-wide in-kernel relayout.
    y_all = jnp.transpose(jnp.concatenate([y_gwc, y_cat], axis=1),
                          (0, 2, 1, 3))                                # (B, Hp, Cy, Wp)
    x_gwc_h = jnp.transpose(x_gwc, (0, 2, 1, 3))                       # (B, Hp, Cg, Wp)

    kernel = functools.partial(_cost_volume_kernel, num_groups=G, cg=Cg, cc=Cc,
                               mxu_dtype=mxu_dtype)

    # Leave headroom below physical VMEM (critical on 64-MiB v7x) but let
    # 128-MiB v5e/v6e use larger tiles than the scoped default allows.
    vmem_limit = max(32 * 1024 * 1024,
                     min(vmem_cap - 16 * 1024 * 1024, 100 * 1024 * 1024))

    vol = pl.pallas_call(
        kernel,
        out_shape=jax.ShapeDtypeStruct((B, Ctot, D, Hp, Wp), out_dtype),
        grid_spec=pltpu.PrefetchScalarGridSpec(
            num_scalar_prefetch=0,
            # D innermost: feature blocks (index maps ignore d) stay
            # VMEM-resident across all disparities; per-step DMA is just the
            # disparity slice + the output slab.
            grid=(B, Hp // tH, D),
            in_specs=[
                pl.BlockSpec((None, None, tH, Wp), lambda b, h, d: (b, d, h, 0)),  # disp
                pl.BlockSpec((None, tH, Cg, Wp), lambda b, h, d: (b, h, 0, 0)),    # x_gwc (h-major)
                pl.BlockSpec((None, Cc, tH, Wp), lambda b, h, d: (b, 0, h, 0)),    # x_cat (c-major)
                pl.BlockSpec((None, tH, Cy, Wp), lambda b, h, d: (b, h, 0, 0)),    # y     (h-major)
            ],
            out_specs=pl.BlockSpec((None, Ctot, None, tH, Wp),
                                   lambda b, h, d: (b, 0, d, h, 0)),
        ),
        compiler_params=pltpu.CompilerParams(
            # No cross-step accumulation anywhere -> all axes legally parallel
            # (lets the v7x megacore shard the D axis as well as B/H).
            dimension_semantics=("parallel", "parallel", "parallel"),
            vmem_limit_bytes=vmem_limit),
    )(disp, x_gwc_h, x_cat, y_all)

    if (Hp, Wp) != (H, W):
        vol = vol[:, :, :, :H, :W]
    return vol


def reference(x_gwc, y_gwc, x_cat, y_cat, disp, num_groups):
    """Pure-JAX reference mirroring the PyTorch module (exact fp32, no matmul)."""
    B, Cg, H, W = x_gwc.shape
    Cc = x_cat.shape[1]
    G = num_groups
    w_pos = jnp.arange(W, dtype=jnp.float32)
    xf = w_pos[None, None, None, :] - disp                           # (B,D,H,W)
    kk = jnp.arange(W, dtype=jnp.float32)
    wmat = jnp.maximum(0.0, 1.0 - jnp.abs(xf[..., None] - kk))       # (B,D,H,W,K)
    yg_w = jnp.sum(y_gwc[:, :, None, :, None, :] * wmat[:, None], axis=-1)  # (B,Cg,D,H,W)
    yc_w = jnp.sum(y_cat[:, :, None, :, None, :] * wmat[:, None], axis=-1)  # (B,Cc,D,H,W)
    keep = (w_pos[None, None, None, :] >= disp).astype(jnp.float32)  # (B,D,H,W)
    xg_m = x_gwc[:, :, None] * keep[:, None]
    xc_m = x_cat[:, :, None] * keep[:, None]
    D = disp.shape[1]
    gwc = (xg_m * yg_w).reshape(B, G, Cg // G, D, H, W).mean(axis=2)
    return jnp.concatenate([gwc, xc_m, yc_w], axis=1)


if __name__ == "__main__":
    key = jax.random.PRNGKey(0)
    B, Cg, Cc, H, W, D, G = 2, 8, 4, 16, 16, 8, 4

    k1, k2, k3, k4, k5 = jax.random.split(key, 5)
    x_gwc = jax.random.normal(k1, (B, Cg, H, W), jnp.float32)
    y_gwc = jax.random.normal(k2, (B, Cg, H, W), jnp.float32)
    x_cat = jax.random.normal(k3, (B, Cc, H, W), jnp.float32)
    y_cat = jax.random.normal(k4, (B, Cc, H, W), jnp.float32)
    # disparity samples in [0, 8) (fractional -> exercises bilinear warp + zero pad)
    disp = jax.random.uniform(k5, (B, D, H, W), jnp.float32, 0.0, 8.0)

    vol = get_cost_volume(x_gwc, y_gwc, x_cat, y_cat, disp, G)
    vol = jax.block_until_ready(vol)

    ref = reference(x_gwc, y_gwc, x_cat, y_cat, disp, G)
    assert vol.shape == (B, G + 2 * Cc, D, H, W), vol.shape
    err = float(jnp.max(jnp.abs(vol - ref)))
    assert err < 1e-3, err

    print("KERNEL_OK")
</pallas_src>

<mosaic_0001>
module attributes {stable_mosaic.version = 11 : i64} {
  func.func @_cost_volume_kernel(%arg0: i32, %arg1: i32, %arg2: i32, %arg3: memref<1x1x16x16xf32, #tpu.memory_space<vmem>>, %arg4: memref<1x16x8x16xf32, #tpu.memory_space<vmem>>, %arg5: memref<1x4x16x16xf32, #tpu.memory_space<vmem>>, %arg6: memref<1x16x12x16xf32, #tpu.memory_space<vmem>>, %arg7: memref<1x12x1x16x16xf32, #tpu.memory_space<vmem>>) attributes {dimension_semantics = [#tpu.dimension_semantics<parallel>, #tpu.dimension_semantics<parallel>, #tpu.dimension_semantics<parallel>], iteration_bounds = array<i64: 2, 1, 8>, scalar_prefetch = 0 : i64, scratch_operands = 0 : i64, tpu.core_type = #tpu.core_type<tc>, window_params = [{transform_indices = @transform_0, window_bounds = array<i64: 1, 1, 16, 16>}, {transform_indices = @transform_1, window_bounds = array<i64: 1, 16, 8, 16>}, {transform_indices = @transform_2, window_bounds = array<i64: 1, 4, 16, 16>}, {transform_indices = @transform_3, window_bounds = array<i64: 1, 16, 12, 16>}, {transform_indices = @transform_4, window_bounds = array<i64: 1, 12, 1, 16, 16>}]} {
    %c0 = arith.constant 0 : index
    %c0_0 = arith.constant 0 : index
    %c0_1 = arith.constant 0 : index
    %c0_2 = arith.constant 0 : index
    %0 = vector.load %arg3[%c0, %c0_0, %c0_1, %c0_2] : memref<1x1x16x16xf32, #tpu.memory_space<vmem>>, vector<1x1x16x16xf32>
    %1 = vector.shape_cast %0 : vector<1x1x16x16xf32> to vector<16x16xf32>
    %2 = tpu.iota {dimensions = array<i32: 1>} : vector<16x16xi32>
    %3 = arith.sitofp %2 : vector<16x16xi32> to vector<16x16xf32>
    %4 = arith.subf %3, %1 : vector<16x16xf32>
    %5 = arith.cmpf oge, %3, %1 : vector<16x16xf32>
    %6 = arith.extui %5 : vector<16x16xi1> to vector<16x16xi32>
    %7 = arith.sitofp %6 : vector<16x16xi32> to vector<16x16xf32>
    %8 = tpu.iota {dimensions = array<i32: 1>} : vector<16x16x16xi32>
    %9 = arith.sitofp %8 : vector<16x16x16xi32> to vector<16x16x16xf32>
    %10 = vector.shape_cast %4 : vector<16x16xf32> to vector<16x1x16xf32>
    %11 = vector.broadcast %10 : vector<16x1x16xf32> to vector<16x16x16xf32>
    %12 = arith.subf %11, %9 : vector<16x16x16xf32>
    %13 = math.absf %12 : vector<16x16x16xf32>
    %cst = arith.constant 1.000000e+00 : f32
    %14 = vector.broadcast %cst : f32 to vector<16x16x16xf32>
    %15 = arith.subf %14, %13 : vector<16x16x16xf32>
    %cst_3 = arith.constant 0.000000e+00 : f32
    %16 = vector.broadcast %cst_3 : f32 to vector<16x16x16xf32>
    %17 = arith.maximumf %16, %15 : vector<16x16x16xf32>
    %c0_4 = arith.constant 0 : index
    %c0_5 = arith.constant 0 : index
    %c0_6 = arith.constant 0 : index
    %c0_7 = arith.constant 0 : index
    %18 = vector.load %arg6[%c0_4, %c0_5, %c0_6, %c0_7] : memref<1x16x12x16xf32, #tpu.memory_space<vmem>>, vector<1x16x12x16xf32>
    %19 = vector.shape_cast %18 : vector<1x16x12x16xf32> to vector<16x12x16xf32>
    "tpu.trace_start"() <{level = 10 : i32, message = "hck,hkw->hcw"}> : () -> ()
    %cst_8 = arith.constant dense<0.000000e+00> : vector<16x12x16xf32>
    %20 = tpu.matmul %19, %17, %cst_8 {dimension_numbers = #tpu.dot_dimension_numbers<[2], [1], [1], [2], [0, 0, 0, 1, 1, 2], [0], [0]>} : vector<16x12x16xf32>, vector<16x16x16xf32>, vector<16x12x16xf32> -> vector<16x12x16xf32>
    "tpu.trace_stop"() : () -> ()
    %21 = vector.extract_strided_slice %20 {offsets = [0, 0, 0], sizes = [16, 8, 16], strides = [1, 1, 1]} : vector<16x12x16xf32> to vector<16x8x16xf32>
    %22 = vector.extract_strided_slice %20 {offsets = [0, 8, 0], sizes = [16, 4, 16], strides = [1, 1, 1]} : vector<16x12x16xf32> to vector<16x4x16xf32>
    %c0_9 = arith.constant 0 : index
    %c0_10 = arith.constant 0 : index
    %c0_11 = arith.constant 0 : index
    %c0_12 = arith.constant 0 : index
    %23 = vector.load %arg4[%c0_9, %c0_10, %c0_11, %c0_12] : memref<1x16x8x16xf32, #tpu.memory_space<vmem>>, vector<1x16x8x16xf32>
    %24 = vector.shape_cast %23 : vector<1x16x8x16xf32> to vector<16x8x16xf32>
    %25 = arith.mulf %24, %21 : vector<16x8x16xf32>
    %26 = vector.extract_strided_slice %25 {offsets = [0, 0, 0], sizes = [16, 2, 16], strides = [1, 1, 1]} : vector<16x8x16xf32> to vector<16x2x16xf32>
    %cst_13 = arith.constant dense<0.000000e+00> : vector<16x16xf32>
    %27 = vector.multi_reduction <add>, %26, %cst_13 [1] : vector<16x2x16xf32> to vector<16x16xf32>
    %28 = vector.extract_strided_slice %25 {offsets = [0, 2, 0], sizes = [16, 2, 16], strides = [1, 1, 1]} : vector<16x8x16xf32> to vector<16x2x16xf32>
    %cst_14 = arith.constant dense<0.000000e+00> : vector<16x16xf32>
    %29 = vector.multi_reduction <add>, %28, %cst_14 [1] : vector<16x2x16xf32> to vector<16x16xf32>
    %30 = vector.extract_strided_slice %25 {offsets = [0, 4, 0], sizes = [16, 2, 16], strides = [1, 1, 1]} : vector<16x8x16xf32> to vector<16x2x16xf32>
    %cst_15 = arith.constant dense<0.000000e+00> : vector<16x16xf32>
    %31 = vector.multi_reduction <add>, %30, %cst_15 [1] : vector<16x2x16xf32> to vector<16x16xf32>
    %32 = vector.extract_strided_slice %25 {offsets = [0, 6, 0], sizes = [16, 2, 16], strides = [1, 1, 1]} : vector<16x8x16xf32> to vector<16x2x16xf32>
    %cst_16 = arith.constant dense<0.000000e+00> : vector<16x16xf32>
    %33 = vector.multi_reduction <add>, %32, %cst_16 [1] : vector<16x2x16xf32> to vector<16x16xf32>
    %34 = vector.shape_cast %27 : vector<16x16xf32> to vector<1x16x16xf32>
    %35 = vector.shape_cast %29 : vector<16x16xf32> to vector<1x16x16xf32>
    %36 = vector.shape_cast %31 : vector<16x16xf32> to vector<1x16x16xf32>
    %37 = vector.shape_cast %33 : vector<16x16xf32> to vector<1x16x16xf32>
    %38 = tpu.concatenate %34, %35, %36, %37 in 0 : vector<1x16x16xf32>, vector<1x16x16xf32>, vector<1x16x16xf32>, vector<1x16x16xf32> -> vector<4x16x16xf32>
    %cst_17 = arith.constant 5.000000e-01 : f32
    %39 = vector.broadcast %cst_17 : f32 to vector<16x16xf32>
    %40 = arith.mulf %7, %39 : vector<16x16xf32>
    %41 = vector.shape_cast %40 : vector<16x16xf32> to vector<1x16x16xf32>
    %42 = vector.broadcast %41 : vector<1x16x16xf32> to vector<4x16x16xf32>
    %43 = arith.mulf %38, %42 : vector<4x16x16xf32>
    %c0_18 = arith.constant 0 : index
    %c0_19 = arith.constant 0 : index
    %c0_20 = arith.constant 0 : index
    %c0_21 = arith.constant 0 : index
    %44 = vector.load %arg5[%c0_18, %c0_19, %c0_20, %c0_21] : memref<1x4x16x16xf32, #tpu.memory_space<vmem>>, vector<1x4x16x16xf32>
    %45 = vector.shape_cast %44 : vector<1x4x16x16xf32> to vector<4x16x16xf32>
    %46 = vector.shape_cast %7 : vector<16x16xf32> to vector<1x16x16xf32>
    %47 = vector.broadcast %46 : vector<1x16x16xf32> to vector<4x16x16xf32>
    %48 = arith.mulf %45, %47 : vector<4x16x16xf32>
    %49 = tpu.transpose %22, [1, 0, 2] : vector<16x4x16xf32> -> vector<4x16x16xf32>
    %c0_22 = arith.constant 0 : index
    %c0_23 = arith.constant 0 : index
    %c0_24 = arith.constant 0 : index
    %c0_25 = arith.constant 0 : index
    %c0_26 = arith.constant 0 : index
    %50 = vector.load %arg7[%c0_22, %c0_23, %c0_24, %c0_25, %c0_26] : memref<1x12x1x16x16xf32, #tpu.memory_space<vmem>>, vector<1x4x1x16x16xf32>
    %51 = vector.shape_cast %50 : vector<1x4x1x16x16xf32> to vector<4x16x16xf32>
    %52 = vector.shape_cast %43 : vector<4x16x16xf32> to vector<1x4x1x16x16xf32>
    tpu.vector_store %arg7[%c0_22, %c0_23, %c0_24, %c0_25, %c0_26], %52 {strides = array<i32>} : memref<1x12x1x16x16xf32, #tpu.memory_space<vmem>>, vector<1x4x1x16x16xf32>,
    %c0_27 = arith.constant 0 : index
    %c4 = arith.constant 4 : index
    %c0_28 = arith.constant 0 : index
    %c0_29 = arith.constant 0 : index
    %c0_30 = arith.constant 0 : index
    %53 = vector.load %arg7[%c0_27, %c4, %c0_28, %c0_29, %c0_30] : memref<1x12x1x16x16xf32, #tpu.memory_space<vmem>>, vector<1x4x1x16x16xf32>
    %54 = vector.shape_cast %53 : vector<1x4x1x16x16xf32> to vector<4x16x16xf32>
    %55 = vector.shape_cast %48 : vector<4x16x16xf32> to vector<1x4x1x16x16xf32>
    tpu.vector_store %arg7[%c0_27, %c4, %c0_28, %c0_29, %c0_30], %55 {strides = array<i32>} : memref<1x12x1x16x16xf32, #tpu.memory_space<vmem>>, vector<1x4x1x16x16xf32>,
    %c0_31 = arith.constant 0 : index
    %c8 = arith.constant 8 : index
    %c0_32 = arith.constant 0 : index
    %c0_33 = arith.constant 0 : index
    %c0_34 = arith.constant 0 : index
    %56 = vector.load %arg7[%c0_31, %c8, %c0_32, %c0_33, %c0_34] : memref<1x12x1x16x16xf32, #tpu.memory_space<vmem>>, vector<1x4x1x16x16xf32>
    %57 = vector.shape_cast %56 : vector<1x4x1x16x16xf32> to vector<4x16x16xf32>
    %58 = vector.shape_cast %49 : vector<4x16x16xf32> to vector<1x4x1x16x16xf32>
    tpu.vector_store %arg7[%c0_31, %c8, %c0_32, %c0_33, %c0_34], %58 {strides = array<i32>} : memref<1x12x1x16x16xf32, #tpu.memory_space<vmem>>, vector<1x4x1x16x16xf32>,
    return
  }
  func.func @transform_0(%arg0: i32, %arg1: i32, %arg2: i32) -> (i32, i32, i32, i32) {
    %c0_i32 = arith.constant 0 : i32
    %c0_i32_0 = arith.constant 0 : i32
    return %arg0, %arg2, %arg1, %c0_i32 : i32, i32, i32, i32
  }
  func.func @transform_1(%arg0: i32, %arg1: i32, %arg2: i32) -> (i32, i32, i32, i32) {
    %c0_i32 = arith.constant 0 : i32
    %c0_i32_0 = arith.constant 0 : i32
    %c0_i32_1 = arith.constant 0 : i32
    return %arg0, %arg1, %c0_i32, %c0_i32_0 : i32, i32, i32, i32
  }
  func.func @transform_2(%arg0: i32, %arg1: i32, %arg2: i32) -> (i32, i32, i32, i32) {
    %c0_i32 = arith.constant 0 : i32
    %c0_i32_0 = arith.constant 0 : i32
    %c0_i32_1 = arith.constant 0 : i32
    return %arg0, %c0_i32, %arg1, %c0_i32_0 : i32, i32, i32, i32
  }
  func.func @transform_3(%arg0: i32, %arg1: i32, %arg2: i32) -> (i32, i32, i32, i32) {
    %c0_i32 = arith.constant 0 : i32
    %c0_i32_0 = arith.constant 0 : i32
    %c0_i32_1 = arith.constant 0 : i32
    return %arg0, %arg1, %c0_i32, %c0_i32_0 : i32, i32, i32, i32
  }
  func.func @transform_4(%arg0: i32, %arg1: i32, %arg2: i32) -> (i32, i32, i32, i32, i32) {
    %c0_i32 = arith.constant 0 : i32
    %c0_i32_0 = arith.constant 0 : i32
    %c0_i32_1 = arith.constant 0 : i32
    return %arg0, %c0_i32, %arg2, %arg1, %c0_i32_0 : i32, i32, i32, i32, i32
  }
}

</mosaic_0001>

<bundles_post_ra>
// kernel: tpu_custom_call.1
= control target key start
LH: loop header
LB: loop body
LE: loop exit
PB: predicated region body
PF: predicated region fallthrough
CT: control target
= control target key end

     0   :  { %s5132_s0 = inlined_call_operand.hbm [shape: f32[2,8,16,16], index: 0, kind: input, shape index: {}]   ;;  %s5133_s1 = inlined_call_operand.hbm [shape: f32[2,16,8,16], index: 1, kind: input, shape index: {}]   ;;  %s5134_s2 = inlined_call_operand.hbm [shape: f32[2,4,16,16], index: 2, kind: input, shape index: {}]   ;;  %s5135_s3 = inlined_call_operand.hbm [shape: f32[2,16,12,16], index: 3, kind: input, shape index: {}]   ;;  %s5136_s4 = inlined_call_operand.hbm [shape: f32[2,12,8,16,16], index: 4, kind: output, shape index: {}]  }
   0x1   :  { %5157 = sst [smem:[#allocation31_spill]] %s5133_s1 }
   0x2   :  { %5158 = sst [smem:[#allocation32_spill]] %s5136_s4 }
   0x3   :  { %9 = vsyncpa [#allocation3], 0 }
   0x4   :  { %11 = vsyncpa [#allocation3 + $0x1], 0 }
   0x5   :  { %12 = vsyncpa [#allocation6], 0 }
   0x6   :  { %14 = vsyncpa [#allocation6 + $0x1], 0 }
   0x7   :  { %15 = vsyncpa [#allocation9], 0 }
   0x8   :  { %17 = vsyncpa [#allocation9 + $0x1], 0 }
   0x9   :  { %18 = vsyncpa [#allocation4], 0 }
   0xa   :  { %20 = vsyncpa [#allocation4 + $0x1], 0  ;;  %s4039_s15 = smov 0   ;;  %s4041_s16 = smov 0  }
   0xb   :  { %s4043_s17 = smov 0   ;;  %s4045_s18 = smov 0  }
   0xc   :  { %s4047_s19 = smov 0   ;;  %s4049_s20 = smov 0  }
   0xd   :  { %s4051_s21 = smov 0   ;;  %s4053_s22 = smov 0  }
   0xe   :  { %s4055_s23 = smov 0   ;;  %s4057_s24 = smov 0  }
   0xf   :  { %s4059_s25 = smov 0  }
  0x10 LB: > { %5159 = sst [smem:[#allocation17_spill]] %s3959_s16  ;;  %p5138_p0 = scmp.eq.s32.totalorder %s3995_s25, 0  ;;  %s3995_s25 = sphi %s4059_s25, %s26_s25   ;;  %s3991_s24 = sphi %s4057_s24, %s5222_s24   ;;  %s3987_s23 = sphi %s4055_s23, %s5221_s23   ;;  %s3983_s22 = sphi %s4053_s22, %s5220_s22   ;;  %s3979_s21 = sphi %s4051_s21, %s5219_s21   ;;  %s3975_s20 = sphi %s4049_s20, %s5218_s20   ;;  %s3971_s19 = sphi %s4047_s19, %s5217_s19   ;;  %s3967_s18 = sphi %s4045_s18, %s5216_s18   ;;  %s3963_s17 = sphi %s4043_s17, %s5215_s17   ;;  %s3959_s16 = sphi %s4041_s16, %s5214_s16   ;;  %s3955_s15 = sphi %s4039_s15, %s5210_s15  }
  0x11   : > { %5160 = sst [smem:[#allocation18_spill]] %s3979_s21  ;;  %p91_p1 = scmp.ne.s32.totalorder %s3963_s17, %s3959_s16 }
  0x12   : > { %5161 = sst [smem:[#allocation19_spill]] %s3983_s22  ;;  %p5137_p3 = scmp.lt.s32.totalorder %s3995_s25, 16 }
  0x13   : > { %p93_p4 = por %p91_p1, %p5138_p0  ;;  %s232_s27 = sand.u32 1, %s3995_s25  }
  0x14   : > { %s4105_s28 = sand.u32 1, %s3963_s17   ;;  %s3392_s30 = sshll.u32 %s3991_s24, 11 }
  0x15   : > { %s3324_s29 = sshll.u32 %s4105_s28, 7  ;;  %s5162_s1 = sld [smem:[#allocation31_spill]] }
  0x16   : > { %s236_s8 = scalar_lea.vmem [#allocation5], %s3324_s29  ;;  %p4116_p5 = pnand %p5137_p3, %p93_p4 }
  0x17   : > { %s245_s9 = sshll.u32 %s236_s8, 4  ;;  %s4124_s11 = scalar_lea.sflag [#allocation6], %s232_s27  ;;  %s4120_s9 = int_to_ptr.vmem [resolvable:$true] %s245_s9 }
  0x18   : > { %s5163_s10 = scalar_select %p4116_p5, 1, 0 }
  0x19   : > { %p4130_p9 = pneg %p4116_p5 }
  0x1b   : > { %s4112_s7 = scalar_lea.hbm %s5162_s1, %s3392_s30  ;;  %s3778_s30 = scalar_lea.hbm %s5162_s1, 4096 }
  0x1c   : > { %s3773_s12 = scalar_lea.hbm %s4112_s7, 2048  ;;  %p3779_p12 = scmp.lt.u32.totalorder %s4112_s7, %s5162_s1 }
  0x1d   : > { %p3774_p8 = scmp.ne.s32.totalorder %s4112_s7, %s3773_s12  ;;  %p3780_p13 = scmp.lt.u32.totalorder %s3778_s30, %s3773_s12 }
  0x1e   : > { %p3782_p4 = scmp.lt.u32.totalorder %s3773_s12, %s4112_s7 }
  0x1f   : > { %p3776_p10 = pnand %p4130_p9, %p3774_p8  ;;  %p3781_p1 = por %p3780_p13, %p3779_p12 }
  0x21   : > { %p3777_p11 = pneg %p3776_p10  ;;  %p3783_p3 = por %p3782_p4, %p3781_p1 }
  0x23   : > { %p3784_p2 = pnand %p3783_p3, %p3777_p11 }
  0x25   : > { %3787 = shalt.err (!%p3784_p2)
}
  0x26   : > { %s3788_s27 = scalar_lea.vmem %s4120_s9, 2048  ;;  %s3997_s8 = smov [#allocation5]  }
  0x27   : > { %p3789_p8 = scmp.ne.s32.totalorder %s4120_s9, %s3788_s27  ;;  %s3793_s14 = sshll.u32 %s3997_s8, 4  ;;  %s3794_s14 = int_to_ptr.vmem [resolvable:$false] %s3793_s14 }
  0x28   : > { %s3795_s29 = scalar_lea.vmem %s3794_s14, 4096  ;;  %p3796_p6 = scmp.lt.s32.totalorder %s4120_s9, %s3794_s14 }
  0x29   : > { %p3791_p10 = pnand %p3789_p8, %p4130_p9  ;;  %p3797_p7 = scmp.lt.s32.totalorder %s3795_s29, %s3788_s27 }
  0x2b   : > { %p3792_p0 = pneg %p3791_p10  ;;  %p3798_p12 = por %p3797_p7, %p3796_p6 }
  0x2d   : > { %p3799_p13 = pnand %p3798_p12, %p3792_p0 }
  0x2f   : > { %3802 = shalt.err (!%p3799_p13)
}
  0x30   : > { %s5139_s12 = smov 128   ;;  %s5141_s30 = smov 8  }
  0x31   : > { %3659 = dma.hbm_to_vmem [thread:$0]  (!%p4116_p5), %s4112_s7, 2048, %s4120_s9, %s4124_s11, %s5139_s12, %s5139_s12, %s5141_s30  }
  0x32   : > { %p5165_p0 = scmp.lt.s32.totalorder %s3995_s25, 17  ;;  %p5166_p2 = scmp.ge.s32.totalorder %s3995_s25, 1 }
  0x33   : > { %s4166_s6 = sadd.s32 4294967295, %s3995_s25   ;;  %s3317_s27 = sadd.s32 4294967294, %s3995_s25  }
  0x34   : > { %p4161_p3 = pnand %p5166_p2, %p5165_p0  ;;  %5168 = sst [smem:[#allocation20_spill]] %s4166_s6 }
  0x35   : > { %s38_s8 = sadd.s32 1, %s3987_s23  ;;  %s45_s7 = sadd.s32 1, %s3991_s24 }
  0x36   : > { %s5167_s5 = scalar_select %p4161_p3, 1, 0 }
  0x37   : > { %p39_p6 = scmp.ge.s32.totalorder %s38_s8, 8  ;;  %s56_s9 = sadd.s32 1, %s3975_s20 }
  0x38   : > { %p63_p7 = scmp.ne.s32.totalorder %s3975_s20, %s3971_s19  ;;  %p5170_p11 = scmp.eq.s32.totalorder %s3995_s25, 0 }
  0x39   : > { %s5224_s8 = smov (%p39_p6, %s38_s8), 0  ;;  %s5226_s7 = smov (!%p39_p6, %s45_s7), %s3991_s24 }
  0x3a   : > { %5169 = sst [smem:[#allocation21_spill]] %s5224_s8  ;;  %s50_s14 = ssub.s32 %s3987_s23, %s5224_s8 }
  0x3b   : > { %p4184_p1 = por %p5170_p11, %p63_p7  ;;  %p47_p4 = scmp.ge.s32.totalorder %s5226_s7, 2 }
  0x3c   : > { %p5144_p8 = scmp.ne.s32.totalorder %s3971_s19, %s3967_s18  ;;  %p70_p10 = scmp.eq.s32.totalorder %s4166_s6, 0 }
  0x3d   : > { %p181_p12 = scmp.eq.s32.totalorder %s4166_s6, 15  ;;  %s5228_s7 = smov (%p47_p4, %s5226_s7), 0 }
  0x3e   : > { %5172 = sst [smem:[#allocation22_spill]] %s5228_s7  ;;  %p4197_p13 = por %p70_p10, %p5144_p8 }
  0x3f   : > { %p5174_p0 = scmp.ne.s32.totalorder %s3959_s16, %s3955_s15  ;;  %s49_s26 = ssub.s32 %s3991_s24, %s5228_s7 }
  0x40   : > { %s5173_s12 = scalar_select %p4197_p13, 1, 0 }
  0x41   : > { %p4204_p2 = por %p5174_p0, %p70_p10  ;;  %p4213_p6 = por %p181_p12, %p63_p7 }
  0x42   : > { %s51_s8 = sor.u32 %s50_s14, %s49_s26  ;;  %p82_p11 = scmp.eq.s32.totalorder %s49_s26, 0 }
  0x43   : > { %s5175_s30 = scalar_select %p4204_p2, 1, 0 }
  0x44   : > { %s5177_s1 = scalar_select %p4213_p6, 1, 0 }
  0x45   : > { %5176 = sst [smem:[#allocation23_spill]] %s5175_s30  ;;  %p54_p4 = scmp.eq.s32.totalorder %s51_s8, 0 }
  0x46   : > { %5178 = sst [smem:[#allocation24_spill]] %s5177_s1  ;;  %p187_p8 = scmp.eq.s32.totalorder %s3317_s27, 15 }
  0x47   : > { %s5179_s4 = sadd.s32 1, %s3963_s17  ;;  %p5181_p10 = scmp.ne.s32.totalorder %s3971_s19, %s3967_s18 }
  0x48   : > { %s4220_s22 = scalar_select %p82_p11, %s3963_s17, %s5179_s4  }
  0x49   : > { %s4223_s15 = scalar_select %p54_p4, %s3975_s20, %s56_s9  }
  0x4a   : > { %p4228_p0 = por %p187_p8, %p5181_p10  ;;  %s207_s21 = sand.u32 1, %s3975_s20  }
  0x4b   : > { %5180 = sst [smem:[#allocation25_spill]] %s4223_s15  ;;  %s3320_s30 = sshll.u32 %s207_s21, 4 }
  0x4c   : > { %s5182_s7 = scalar_select %p4228_p0, 1, 0 }
  0x4d   : > { %s3321_s1 = sshll.u32 %s3987_s23, 1  ;;  %s3322_s14 = sshll.u32 %s3991_s24, 4 }
  0x4e   : > { %s211_s16 = scalar_lea.vmem [#allocation2], %s3320_s30  ;;  %s219_s26 = sadd.s32 %s3322_s14, %s3321_s1 }
  0x4f   : > { %s222_s6 = sshll.u32 %s211_s16, 4  ;;  %s3323_s27 = sshll.u32 %s219_s26, 7  ;;  %s4235_s6 = int_to_ptr.vmem [resolvable:$true] %s222_s6 }
  0x50   : > { %p5183_p7 = scmp.lt.s32.totalorder %s3995_s25, 16  ;;  %s4248_s15 = scalar_lea.hbm %s5132_s0, %s3323_s27 }
  0x51   : > { %s3327_s1 = sshll.u32 %s4105_s28, 6  ;;  %s4251_s16 = scalar_lea.sflag [#allocation3], %s207_s21 }
  0x52   : > { %p4241_p12 = pnand %p5183_p7, %p4184_p1  ;;  %s3803_s30 = scalar_lea.hbm %s4248_s15, 256 }
  0x53   : > { %p3804_p8 = scmp.ne.s32.totalorder %s4248_s15, %s3803_s30  ;;  %s3808_s26 = scalar_lea.hbm %s5132_s0, 4096 }
  0x54   : > { %p3805_p1 = pneg %p4241_p12  ;;  %p3809_p10 = scmp.lt.u32.totalorder %s4248_s15, %s5132_s0 }
  0x55   : > { %p3810_p7 = scmp.lt.u32.totalorder %s3808_s26, %s3803_s30  ;;  %p3812_p6 = scmp.lt.u32.totalorder %s3803_s30, %s4248_s15 }
  0x56   : > { %p3806_p11 = pnand %p3805_p1, %p3804_p8 }
  0x57   : > { %p3811_p0 = por %p3810_p7, %p3809_p10 }
  0x58   : > { %p3807_p4 = pneg %p3806_p11 }
  0x59   : > { %p3813_p2 = por %p3812_p6, %p3811_p0 }
  0x5b   : > { %p3814_p13 = pnand %p3813_p2, %p3807_p4 }
  0x5d   : > { %3817 = shalt.err (!%p3814_p13)
}
  0x5e   : > { %s3818_s21 = scalar_lea.vmem %s4235_s6, 256  ;;  %s4000_s9 = smov [#allocation2]  }
  0x5f   : > { %p3819_p8 = scmp.ne.s32.totalorder %s4235_s6, %s3818_s21  ;;  %s3823_s29 = sshll.u32 %s4000_s9, 4  ;;  %s3824_s29 = int_to_ptr.vmem [resolvable:$false] %s3823_s29 }
  0x60   : > { %s3825_s14 = scalar_lea.vmem %s3824_s29, 512  ;;  %p3826_p5 = scmp.lt.s32.totalorder %s4235_s6, %s3824_s29 }
  0x61   : > { %p3821_p11 = pnand %p3819_p8, %p3805_p1  ;;  %p3827_p10 = scmp.lt.s32.totalorder %s3825_s14, %s3818_s21 }
  0x63   : > { %p3822_p3 = pneg %p3821_p11  ;;  %p3828_p7 = por %p3827_p10, %p3826_p5 }
  0x65   : > { %p3829_p6 = pnand %p3828_p7, %p3822_p3 }
  0x67   : > { %3832 = shalt.err (!%p3829_p6)
}
  0x68   : > { %s5185_s30 = smov 8   ;;  %s5186_s26 = smov 128  }
  0x69   : > { %3656 = dma.hbm_to_vmem [thread:$0]  (!%p4241_p12), %s4248_s15, 256, %s4235_s6, %s4251_s16, %s5186_s26, %s5186_s26, %s5185_s30  }
  0x6a   : > { %s3393_s27 = sshll.u32 %s3991_s24, 10  ;;  %s259_s8 = scalar_lea.vmem [#allocation7], %s3327_s1 }
  0x6b   : > { %s268_s9 = sshll.u32 %s259_s8, 4  ;;  %s4288_s14 = scalar_lea.hbm %s5134_s2, %s3393_s27  ;;  %s4290_s9 = int_to_ptr.vmem [resolvable:$true] %s268_s9 }
  0x6c   : > { %s3833_s4 = scalar_lea.hbm %s4288_s14, 1024  ;;  %s3838_s1 = scalar_lea.hbm %s5134_s2, 2048 }
  0x6d   : > { %p3834_p5 = scmp.ne.s32.totalorder %s4288_s14, %s3833_s4  ;;  %p3839_p2 = scmp.lt.u32.totalorder %s4288_s14, %s5134_s2 }
  0x6e   : > { %p3840_p0 = scmp.lt.u32.totalorder %s3838_s1, %s3833_s4  ;;  %p3842_p1 = scmp.lt.u32.totalorder %s3833_s4, %s4288_s14 }
  0x6f   : > { %p3836_p3 = pnand %p3834_p5, %p4130_p9 }
  0x70   : > { %p3841_p12 = por %p3840_p0, %p3839_p2 }
  0x71   : > { %p3837_p13 = pneg %p3836_p3 }
  0x72   : > { %p3843_p4 = por %p3842_p1, %p3841_p12 }
  0x74   : > { %p3844_p8 = pnand %p3843_p4, %p3837_p13 }
  0x76   : > { %3847 = shalt.err (!%p3844_p8)
}
  0x77   : > { %s3848_s27 = scalar_lea.vmem %s4290_s9, 1024  ;;  %s4001_s21 = smov [#allocation7]  }
  0x78   : > { %p3849_p11 = scmp.ne.s32.totalorder %s4290_s9, %s3848_s27  ;;  %s3853_s29 = sshll.u32 %s4001_s21, 4  ;;  %s3854_s29 = int_to_ptr.vmem [resolvable:$false] %s3853_s29 }
  0x79   : > { %s3855_s6 = scalar_lea.vmem %s3854_s29, 2048  ;;  %p3856_p6 = scmp.lt.s32.totalorder %s4290_s9, %s3854_s29 }
  0x7a   : > { %p3851_p10 = pnand %p3849_p11, %p4130_p9  ;;  %p3857_p5 = scmp.lt.s32.totalorder %s3855_s6, %s3848_s27 }
  0x7c   : > { %p3852_p7 = pneg %p3851_p10  ;;  %p3858_p3 = por %p3857_p5, %p3856_p6 }
  0x7e   : > { %p3859_p2 = pnand %p3858_p3, %p3852_p7 }
  0x80   : > { %3862 = shalt.err (!%p3859_p2)
}
  0x81   : > { %p5187_p13 = scmp.ne.s32.totalorder %s5163_s10, 0  ;;  %s3330_s4 = sshll.u32 %s4105_s28, 8 }
  0x82   : > { %s3394_s15 = sshll.u32 %s3991_s24, 12  ;;  %s282_s27 = scalar_lea.vmem [#allocation8], %s3330_s4 }
  0x83   : > { %3662 = dma.hbm_to_vmem [thread:$0]  (!%p5187_p13), %s4288_s14, 1024, %s4290_s9, %s4124_s11, %s5186_s26, %s5186_s26, %s5185_s30  }
  0x84   : > { %s4322_s8 = scalar_lea.hbm %s5135_s3, %s3394_s15  ;;  %s292_s21 = sshll.u32 %s282_s27, 4  ;;  %s4324_s21 = int_to_ptr.vmem [resolvable:$true] %s292_s21 }
  0x85   : > { %s279_s29 = scalar_lea.sflag [#allocation9], %s4105_s28  ;;  %s3863_s6 = scalar_lea.hbm %s4322_s8, 4096 }
  0x86   : > { %p3864_p0 = scmp.ne.s32.totalorder %s4322_s8, %s3863_s6  ;;  %s3868_s14 = scalar_lea.hbm %s5135_s3, 8192 }
  0x87   : > { %p3869_p4 = scmp.lt.u32.totalorder %s4322_s8, %s5135_s3  ;;  %p3870_p8 = scmp.lt.u32.totalorder %s3868_s14, %s3863_s6 }
  0x88   : > { %p3866_p12 = pnand %p3864_p0, %p4130_p9  ;;  %p3872_p10 = scmp.lt.u32.totalorder %s3863_s6, %s4322_s8 }
  0x89   : > { %p3871_p11 = por %p3870_p8, %p3869_p4 }
  0x8a   : > { %p3867_p1 = pneg %p3866_p12 }
  0x8b   : > { %p3873_p7 = por %p3872_p10, %p3871_p11 }
  0x8d   : > { %p3874_p6 = pnand %p3873_p7, %p3867_p1 }
  0x8f   : > { %3877 = shalt.err (!%p3874_p6)
}
  0x90   : > { %s3878_s4 = scalar_lea.vmem %s4324_s21, 4096  ;;  %s4002_s16 = smov [#allocation8]  }
  0x91   : > { %p3879_p5 = scmp.ne.s32.totalorder %s4324_s21, %s3878_s4  ;;  %s3883_s27 = sshll.u32 %s4002_s16, 4  ;;  %s3884_s27 = int_to_ptr.vmem [resolvable:$false] %s3883_s27 }
  0x92   : > { %s3885_s11 = scalar_lea.vmem %s3884_s27, 8192  ;;  %p3886_p0 = scmp.lt.s32.totalorder %s4324_s21, %s3884_s27 }
  0x93   : > { %p3881_p3 = pnand %p3879_p5, %p4130_p9  ;;  %p3887_p12 = scmp.lt.s32.totalorder %s3885_s11, %s3878_s4 }
  0x95   : > { %p3882_p2 = pneg %p3881_p3  ;;  %p3888_p4 = por %p3887_p12, %p3886_p0 }
  0x97   : > { %p3889_p8 = pnand %p3888_p4, %p3882_p2 }
  0x99   : > { %3892 = shalt.err (!%p3889_p8)
}
  0x9a   : > { %3665 = dma.hbm_to_vmem [thread:$0]  (!%p5187_p13), %s4322_s8, 4096, %s4324_s21, %s279_s29, %s5186_s26, %s5186_s26, %s5185_s30  }
  0x9b   : > { %p5188_p9 = scmp.ne.s32.totalorder %s5167_s5, 0 }
  0x9d   : > { %304 = sbr.rel (%p5188_p9) target bundleno = 635 (0x27b), region = 36 }
  0xa4   : > { %s4356_s13 = sand.u32 1, %s3971_s19   ;;  %p5189_p1 = scmp.ne.s32.totalorder %s5173_s12, 0 }
  0xa5   : > { %s3334_s6 = sshll.u32 %s4356_s13, 4  ;;  %s307_s9 = scalar_lea.sflag [#allocation3], %s4356_s13 }
  0xa6   : > { %s4360_s10 = scalar_lea.vmem [#allocation2], %s3334_s6 }
  0xa7   : > { %3938 = dma.done.wait (%p5189_p1), %s307_s9, 256  }
  0xa8   : > { %3940 = vsyncadd (%p5189_p1), %s307_s9, 4294967040  ;;  %s5190_s28 = sld [smem:[#allocation20_spill]]  ;;  %s5191_s30 = sld [smem:[#allocation17_spill]] }
  0xa9   : > { %s5192_s26 = sld [smem:[#allocation23_spill]] }
  0xae   : > { %s315_s5 = sand.u32 1, %s5190_s28   ;;  %s317_s8 = sand.u32 1, %s5191_s30  }
  0xaf   : > { %s3335_s21 = sshll.u32 %s317_s8, 7  ;;  %s316_s29 = scalar_lea.sflag [#allocation6], %s315_s5 }
  0xb0   : > { %s4368_s14 = scalar_lea.vmem [#allocation5], %s3335_s21  ;;  %p5193_p13 = scmp.ne.s32.totalorder %s5192_s26, 0 }
  0xb2   : > { %3942 = dma.done.wait (%p5193_p13), %s316_s29, 3072  }
  0xb3   : > { %3944 = vsyncadd (%p5193_p13), %s316_s29, 4294964224  ;;  %s3336_s15 = sshll.u32 %s317_s8, 6  ;;  %s3337_s1 = sshll.u32 %s317_s8, 8 }
  0xb4   : > { %s4374_s4 = scalar_lea.vmem [#allocation7], %s3336_s15  ;;  %s334_s12 = scalar_lea.sflag [#allocation9], %s317_s8 }
  0xb5   : > { %s4376_s16 = scalar_lea.vmem [#allocation8], %s3337_s1 }
  0xb6   : > { %3946 = dma.done.wait (%p5193_p13), %s334_s12, 4096  }
  0xb7   : > { %3948 = vsyncadd (%p5193_p13), %s334_s12, 4294963200  ;;  %v384_v0 = vlaneseq  ;;  %v4003_v1 = vmov 1966171168   ;;  %vm740_vm0 = vcmask 130048   ;;  %s3635_s27 = smul.u32 192, %s4356_s13  ;;  %v382_v8 = vld [vmem:[%s4360_s10] sm:$0xff] }
  0xb8   : > { %v404_v2 = vunpack.c.l.s4 %v4003_v1  ;;  %v2728_v9 = vld [vmem:[%s4374_s4] sm:$0xff]  ;;  %v2730_v10 = vld [vmem:[%s4374_s4 + $0x10] sm:$0xff]  ;;  %v4004_v16 = vmov 0.0   ;;  %v4431_v31 = vld [vmem:[%s4360_s10 + $0x8] sm:$0xff]  ;;  %vm2069_vm3 = vcmask 123904   ;;  %vm2945_vm4 = vcmask 1041409  }
  0xb9   : > { %v385_v3 = vand.u32 127, %v384_v0  ;;  %v4382_v4 = vshrl.u32 %v384_v0, 7  ;;  %v2732_v13 = vld [vmem:[%s4374_s4 + $0x20] sm:$0xff]  ;;  %v2734_v14 = vld [vmem:[%s4374_s4 + $0x30] sm:$0xff]  ;;  %s4419_s11 = scalar_lea.vmem [#allocation10], %s3635_s27  ;;  %vm2948_vm5 = vcmask 1042434  }
  0xba   : > { %v405_v5 = vunpack.c.0.s8 %v404_v2  ;;  %v708_v15 = vld [vmem:[%s4376_s16] sm:$0xff]  ;;  %v710_v18 = vld [vmem:[%s4376_s16 + $0x10] sm:$0xff]  ;;  %vm2951_vm6 = vcmask 1043459   ;;  %vm2954_vm7 = vcmask 1044484   ;;  %vm2957_vm8 = vcmask 1045509   ;;  %s3098_s6 = scalar_lea.sflag [#allocation4], %s4356_s13 }
  0xbb   : > { %v4384_v6 = vcvt.s32.f32 %v385_v3  ;;  %v397_v12 = vadd.s32 8, %v4382_v4  ;;  %3463 = vmatprep.mubr.msk.f32.mxu0 %vm740_vm0, %v708_v15  ;;  %v4406_v21 = vsub.s32 0, %v4382_v4  ;;  %3470 = vmatprep.mubr.msk.f32.mxu1 %vm740_vm0, %v710_v18  ;;  %v4411_v23 = vcvt.s32.f32 %v4382_v4 }
  0xbc   : > { %v4387_v7 = vsub.s32 %v405_v5, %v4382_v4  ;;  %vm2960_vm9 = vcmask 1046534   ;;  %vm2963_vm10 = vcmask 1047559  }
  0xbd   : > { %v387_v11 = vsub.f32 %v4384_v6, %v382_v8  ;;  %vm389_vm1 = vcmp.ge.f32.partialorder %v4384_v6, %v382_v8  ;;  %v4416_v27 = vcvt.s32.f32 %v397_v12  ;;  %v4438_v37 = vsub.f32 %v4384_v6, %v4431_v31 }
  0xbe   : > { %v4400_v17 = vsel %vm389_vm1, 1.0, %v4004_v16  ;;  %vm390_vm2 = vcmp.ge.f32.partialorder %v4384_v6, %v4431_v31 }
  0xbf   : > { %v402_v19 = vcombine.high %v387_v11, %v387_v11  ;;  %v409_v20 = vrot.slane %v387_v11, %v4387_v7  ;;  %v2736_v22 = vmul.f32 %v4400_v17, %v2728_v9  ;;  %v2738_v24 = vmul.f32 %v4400_v17, %v2730_v10 }
  0xc0   : > { %v2740_v25 = vmul.f32 %v4400_v17, %v2732_v13  ;;  %v2742_v26 = vmul.f32 %v4400_v17, %v2734_v14 }
  0xc1   : > { %v425_v28 = vrot.slane %v409_v20, %v4387_v7  ;;  %3372 = vst.msk [vmem:[%s4419_s11 + $0x40] sm:$0xff] %vm740_vm0, %v2736_v22  ;;  %v417_v29 = vcombine.high %v409_v20, %v409_v20  ;;  %v416_v30 = vrot.slane %v402_v19, %v4387_v7  ;;  %3374 = vst.msk [vmem:[%s4419_s11 + $0x50] sm:$0xff] %vm740_vm0, %v2738_v24 }
  0xc2   : > { %3376 = vst.msk [vmem:[%s4419_s11 + $0x60] sm:$0xff] %vm740_vm0, %v2740_v25  ;;  %3378 = vst.msk [vmem:[%s4419_s11 + $0x70] sm:$0xff] %vm740_vm0, %v2742_v26  ;;  %v709_v25 = vld [vmem:[%s4376_s16 + $0x8] sm:$0xf] }
  0xc3   : > { %v447_v32 = vcombine.high %v425_v28, %v425_v28  ;;  %v503_v33 = vrot.slane %v425_v28, %v4406_v21  ;;  %v439_v34 = vrot.slane %v417_v29, %v4387_v7  ;;  %v432_v35 = vrot.slane %v416_v30, %v4387_v7 }
  0xc4   : > { %v418_v36 = vcombine.high %v416_v30, %v416_v30 }
  0xc5   : > { %v580_v38 = vsub.f32 %v503_v33, %v4411_v23  ;;  %v581_v39 = vsub.f32 %v503_v33, %v4416_v27  ;;  %v449_v40 = vcombine.high %v439_v34, %v439_v34  ;;  %v507_v41 = vrot.slane %v439_v34, %v4406_v21 }
  0xc6   : > { %v511_v42 = vrot.slane %v447_v32, %v4406_v21  ;;  %v519_v43 = vrot.slane %v432_v35, %v4406_v21  ;;  %v4446_v44 = vrot.slane %v418_v36, %v4387_v7  ;;  %v448_v45 = vcombine.high %v432_v35, %v432_v35  ;;  %v711_v32 = vld [vmem:[%s4376_s16 + $0x18] sm:$0xf] }
  0xc7   : > { %v612_v46 = vand.u32 2147483647, %v580_v38  ;;  %v613_v47 = vand.u32 2147483647, %v581_v39  ;;  %v582_v48 = vsub.f32 %v507_v41, %v4411_v23  ;;  %v583_v49 = vsub.f32 %v507_v41, %v4416_v27  ;;  %v712_v39 = vld [vmem:[%s4376_s16 + $0x20] sm:$0xff]  ;;  %v714_v41 = vld [vmem:[%s4376_s16 + $0x30] sm:$0xff] }
  0xc8   : > { %v584_v50 = vsub.f32 %v511_v42, %v4411_v23  ;;  %v585_v51 = vsub.f32 %v511_v42, %v4416_v27  ;;  %v515_v52 = vrot.slane %v449_v40, %v4406_v21  ;;  %v588_v53 = vsub.f32 %v519_v43, %v4411_v23  ;;  %v713_v40 = vld [vmem:[%s4376_s16 + $0x28] sm:$0xf] }
  0xc9   : > { %v644_v54 = vsub.f32 1.0, %v612_v46  ;;  %v645_v55 = vsub.f32 1.0, %v613_v47  ;;  %v614_v56 = vand.u32 2147483647, %v582_v48  ;;  %v615_v57 = vand.u32 2147483647, %v583_v49 }
  0xca   : > { %v616_v58 = vand.u32 2147483647, %v584_v50  ;;  %v617_v59 = vand.u32 2147483647, %v585_v51  ;;  %v586_v60 = vsub.f32 %v515_v52, %v4411_v23  ;;  %v587_v61 = vsub.f32 %v515_v52, %v4416_v27 }
  0xcb   : > { %v676_v62 = vmax.f32 %v644_v54, 0.0  ;;  %v677_v63 = vmax.f32 %v645_v55, 0.0  ;;  %v646_v0 = vsub.f32 1.0, %v614_v56  ;;  %v647_v1 = vsub.f32 1.0, %v615_v57  ;;  %v2731_v54 = vld [vmem:[%s4374_s4 + $0x18] sm:$0xff] }
  0xcc   : > { %v648_v2 = vsub.f32 1.0, %v616_v58  ;;  %v649_v3 = vsub.f32 1.0, %v617_v59  ;;  %v618_v5 = vand.u32 2147483647, %v586_v60  ;;  %v619_v8 = vand.u32 2147483647, %v587_v61 }
  0xcd   : > { %v3571_v9 = vpack.c.bf16 %v677_v63, %v676_v62  ;;  %v678_v10 = vmax.f32 %v646_v0, 0.0  ;;  %v679_v11 = vmax.f32 %v647_v1, 0.0  ;;  %v589_v12 = vsub.f32 %v519_v43, %v4416_v27  ;;  %v716_v58 = vld [vmem:[%s4376_s16 + $0x40] sm:$0xff]  ;;  %v715_v59 = vld [vmem:[%s4376_s16 + $0x38] sm:$0xf]  ;;  %v2733_v0 = vld [vmem:[%s4374_s4 + $0x28] sm:$0xff] }
  0xce   : > { %v680_v13 = vmax.f32 %v648_v2, 0.0  ;;  %v681_v14 = vmax.f32 %v649_v3, 0.0  ;;  %v650_v15 = vsub.f32 1.0, %v618_v5  ;;  %v651_v18 = vsub.f32 1.0, %v619_v8  ;;  %v2735_v1 = vld [vmem:[%s4374_s4 + $0x38] sm:$0xff] }
  0xcf   : > { %3572 = vmatprep.subr.bf16.mxu0 %v3571_v9  ;;  %v3575_v19 = vpack.c.bf16 %v679_v11, %v678_v10  ;;  %v620_v20 = vand.u32 2147483647, %v588_v53  ;;  %v621_v22 = vand.u32 2147483647, %v589_v12  ;;  %v523_v24 = vrot.slane %v4446_v44, %v4406_v21  ;;  %v2729_v53 = vld [vmem:[%s4374_s4 + $0x8] sm:$0xff] }
  0xd0   : > { %3574 = vmatpush3.bf16.msra.mxu0 %v3571_v9  ;;  %v3579_v26 = vpack.c.bf16 %v681_v14, %v680_v13  ;;  %v682_v28 = vmax.f32 %v650_v15, 0.0  ;;  %v683_v29 = vmax.f32 %v651_v18, 0.0  ;;  %v527_v30 = vrot.slane %v448_v45, %v4406_v21  ;;  %v717_v5 = vld [vmem:[%s4376_s16 + $0x48] sm:$0xf] }
  0xd1   : > { %3576 = vmatprep.subr.bf16.mxu1 %v3575_v19  ;;  %v652_v33 = vsub.f32 1.0, %v620_v20  ;;  %v653_v34 = vsub.f32 1.0, %v621_v22  ;;  %v590_v35 = vsub.f32 %v523_v24, %v4411_v23  ;;  %v591_v36 = vsub.f32 %v523_v24, %v4416_v27  ;;  %v720_v22 = vld [vmem:[%s4376_s16 + $0x60] sm:$0xff] }
  0xd2   : > { %3578 = vmatpush3.bf16.msra.mxu1 %v3575_v19  ;;  %3580 = vmatprep.subr.bf16.mxu0 %v3579_v26  ;;  %v3583_v38 = vpack.c.bf16 %v683_v29, %v682_v28  ;;  %v592_v42 = vsub.f32 %v527_v30, %v4411_v23  ;;  %v593_v43 = vsub.f32 %v527_v30, %v4416_v27  ;;  %v719_v29 = vld [vmem:[%s4376_s16 + $0x58] sm:$0xf] }
  0xd3   : > { %3464 = vmatmul.mubr.msk.f32.vlgmr.msra.gmra.mrb[0].mxu0 %vm740_vm0, %v709_v25  ;;  %v684_v45 = vmax.f32 %v652_v33, 0.0  ;;  %v685_v46 = vmax.f32 %v653_v34, 0.0  ;;  %v622_v47 = vand.u32 2147483647, %v590_v35  ;;  %v623_v48 = vand.u32 2147483647, %v591_v36 }
  0xd4   : > { %3582 = vmatpush3.bf16.msra.mxu0 %v3579_v26  ;;  %3584 = vmatprep.subr.bf16.mxu1 %v3583_v38  ;;  %v624_v49 = vand.u32 2147483647, %v592_v42  ;;  %v625_v50 = vand.u32 2147483647, %v593_v43  ;;  %v450_v51 = vcombine.high %v4446_v44, %v4446_v44  ;;  %v458_v52 = vrot.slane %v4438_v37, %v4387_v7  ;;  %v721_v33 = vld [vmem:[%s4376_s16 + $0x68] sm:$0xf] }
  0xd5   : > { %3471 = vmatmul.mubr.msk.f32.vlgmr.msra.gmra.mrb[0].mxu1 %vm740_vm0, %v711_v32  ;;  %3477 = vmatprep.mubr.msk.f32.mxu0 %vm740_vm0, %v712_v39  ;;  %v3587_v55 = vpack.c.bf16 %v685_v46, %v684_v45  ;;  %v654_v56 = vsub.f32 1.0, %v622_v47  ;;  %v655_v57 = vsub.f32 1.0, %v623_v48  ;;  %v4485_v44 = vsel %vm390_vm2, 1.0, %v4004_v16  ;;  %v718_v16 = vld [vmem:[%s4376_s16 + $0x50] sm:$0xff]  ;;  %v724_v45 = vld [vmem:[%s4376_s16 + $0x80] sm:$0xff] }
  0xd6   : > { %3586 = vmatpush3.bf16.msra.mxu1 %v3583_v38  ;;  %3484 = vmatprep.mubr.msk.f32.mxu1 %vm740_vm0, %v714_v41  ;;  %v656_v60 = vsub.f32 1.0, %v624_v49  ;;  %v657_v61 = vsub.f32 1.0, %v625_v50  ;;  %v531_v62 = vrot.slane %v450_v51, %v4406_v21  ;;  %v474_v63 = vrot.slane %v458_v52, %v4387_v7  ;;  %v722_v38 = vld [vmem:[%s4376_s16 + $0x70] sm:$0xff] }
  0xd7   : > { %3478 = vmatmul.mubr.msk.f32.vlgmr.msra.gmra.mrb[2].mxu0 %vm740_vm0, %v713_v40  ;;  %3588 = vmatprep.subr.bf16.mxu0 %v3587_v55  ;;  %v686_v2 = vmax.f32 %v654_v56, 0.0  ;;  %v687_v6 = vmax.f32 %v655_v57, 0.0  ;;  %v2737_v31 = vmul.f32 %v4485_v44, %v2729_v53  ;;  %v2739_v3 = vmul.f32 %v4485_v44, %v2731_v54 }
  0xd8   : > { %3590 = vmatpush3.bf16.msra.mxu0 %v3587_v55  ;;  %3491 = vmatprep.mubr.msk.f32.mxu0 %vm740_vm0, %v716_v58  ;;  %v688_v8 = vmax.f32 %v656_v60, 0.0  ;;  %v689_v9 = vmax.f32 %v657_v61, 0.0  ;;  %v594_v10 = vsub.f32 %v531_v62, %v4411_v23  ;;  %v595_v11 = vsub.f32 %v531_v62, %v4416_v27  ;;  %v723_v62 = vld [vmem:[%s4376_s16 + $0x78] sm:$0xf] }
  0xd9   : > { %3485 = vmatmul.mubr.msk.f32.vlgmr.msra.gmra.mrb[2].mxu1 %vm740_vm0, %v715_v59  ;;  %v3591_v12 = vpack.c.bf16 %v687_v6, %v686_v2  ;;  %v535_v13 = vrot.slane %v474_v63, %v4406_v21  ;;  %v2741_v14 = vmul.f32 %v4485_v44, %v2733_v0  ;;  %v2743_v15 = vmul.f32 %v4485_v44, %v2735_v1  ;;  %v726_v6 = vld [vmem:[%s4376_s16 + $0x90] sm:$0xff] }
  0xda   : > { %3373 = vst.msk [vmem:[%s4419_s11 + $0x48] sm:$0xff] %vm740_vm0, %v2737_v31  ;;  %3375 = vst.msk [vmem:[%s4419_s11 + $0x58] sm:$0xff] %vm740_vm0, %v2739_v3  ;;  %v3595_v18 = vpack.c.bf16 %v689_v9, %v688_v8  ;;  %3498 = vmatprep.mubr.msk.f32.mxu1 %vm740_vm0, %v718_v16  ;;  %v626_v19 = vand.u32 2147483647, %v594_v10  ;;  %v627_v20 = vand.u32 2147483647, %v595_v11  ;;  %v466_v24 = vcombine.high %v458_v52, %v458_v52 }
  0xdb   : > { %3592 = vmatprep.subr.bf16.mxu1 %v3591_v12  ;;  %3492 = vmatmul.mubr.msk.f32.vlgmr.msra.gmra.mrb[4].mxu0 %vm740_vm0, %v717_v5  ;;  %v596_v25 = vsub.f32 %v535_v13, %v4411_v23  ;;  %v597_v26 = vsub.f32 %v535_v13, %v4416_v27  ;;  %3377 = vst.msk [vmem:[%s4419_s11 + $0x68] sm:$0xff] %vm740_vm0, %v2741_v14  ;;  %3379 = vst.msk [vmem:[%s4419_s11 + $0x78] sm:$0xff] %vm740_vm0, %v2743_v15  ;;  %v725_v3 = vld [vmem:[%s4376_s16 + $0x88] sm:$0xf] }
  0xdc   : > { %v496_v28 = vcombine.high %v474_v63, %v474_v63  ;;  %3594 = vmatpush3.bf16.msra.mxu1 %v3591_v12  ;;  %3596 = vmatprep.subr.bf16.mxu0 %v3595_v18  ;;  %v658_v30 = vsub.f32 1.0, %v626_v19  ;;  %v659_v32 = vsub.f32 1.0, %v627_v20  ;;  %v488_v34 = vrot.slane %v466_v24, %v4387_v7 }
  0xdd   : > { %3598 = vmatpush3.bf16.msra.mxu0 %v3595_v18  ;;  %3505 = vmatprep.mubr.msk.f32.mxu0 %vm740_vm0, %v720_v22  ;;  %v628_v35 = vand.u32 2147483647, %v596_v25  ;;  %v629_v36 = vand.u32 2147483647, %v597_v26  ;;  %v451_v40 = vcombine.high %v4438_v37, %v4438_v37  ;;  %v728_v26 = vld [vmem:[%s4376_s16 + $0xa0] sm:$0xff] }
  0xde   : > { %v543_v39 = vrot.slane %v496_v28, %v4406_v21  ;;  %v690_v41 = vmax.f32 %v658_v30, 0.0  ;;  %v691_v42 = vmax.f32 %v659_v32, 0.0  ;;  %v539_v43 = vrot.slane %v488_v34, %v4406_v21 }
  0xdf   : > { %v498_v46 = vcombine.high %v488_v34, %v488_v34  ;;  %3499 = vmatmul.mubr.msk.f32.vlgmr.msra.gmra.mrb[4].mxu1 %vm740_vm0, %v719_v29  ;;  %v660_v47 = vsub.f32 1.0, %v628_v35  ;;  %v661_v48 = vsub.f32 1.0, %v629_v36  ;;  %v465_v60 = vrot.slane %v451_v40, %v4387_v7  ;;  %v727_v36 = vld [vmem:[%s4376_s16 + $0x98] sm:$0xf] }
  0xe0   : > { %v600_v49 = vsub.f32 %v543_v39, %v4411_v23  ;;  %v601_v50 = vsub.f32 %v543_v39, %v4416_v27  ;;  %v3599_v51 = vpack.c.bf16 %v691_v42, %v690_v41  ;;  %3506 = vmatmul.mubr.msk.f32.vlgmr.msra.gmra.mrb[6].mxu0 %vm740_vm0, %v721_v33  ;;  %3512 = vmatprep.mubr.msk.f32.mxu1 %vm740_vm0, %v722_v38  ;;  %v729_v33 = vld [vmem:[%s4376_s16 + $0xa8] sm:$0xf] }
  0xe1   : > { %v598_v37 = vsub.f32 %v539_v43, %v4411_v23  ;;  %v599_v52 = vsub.f32 %v539_v43, %v4416_v27  ;;  %v692_v53 = vmax.f32 %v660_v47, 0.0  ;;  %v693_v54 = vmax.f32 %v661_v48, 0.0  ;;  %3519 = vmatprep.mubr.msk.f32.mxu0 %vm740_vm0, %v724_v45  ;;  %v730_v43 = vld [vmem:[%s4376_s16 + $0xb0] sm:$0xff]  ;;  %v732_v45 = vld [vmem:[%s4376_s16 + $0xc0] sm:$0xff] }
  0xe2   : > { %v632_v55 = vand.u32 2147483647, %v600_v49  ;;  %v633_v56 = vand.u32 2147483647, %v601_v50  ;;  %3600 = vmatprep.subr.bf16.mxu1 %v3599_v51  ;;  %v547_v59 = vrot.slane %v498_v46, %v4406_v21  ;;  %v481_v9 = vrot.slane %v465_v60, %v4387_v7 }
  0xe3   : > { %v630_v57 = vand.u32 2147483647, %v598_v37  ;;  %v631_v58 = vand.u32 2147483647, %v599_v52  ;;  %3602 = vmatpush3.bf16.msra.mxu1 %v3599_v51  ;;  %v3603_v61 = vpack.c.bf16 %v693_v54, %v692_v53  ;;  %v467_v10 = vcombine.high %v465_v60, %v465_v60  ;;  %v731_v52 = vld [vmem:[%s4376_s16 + $0xb8] sm:$0xf] }
  0xe4   : > { %v664_v63 = vsub.f32 1.0, %v632_v55  ;;  %v665_v0 = vsub.f32 1.0, %v633_v56  ;;  %v602_v16 = vsub.f32 %v547_v59, %v4411_v23  ;;  %v603_v31 = vsub.f32 %v547_v59, %v4416_v27  ;;  %v734_v60 = vld [vmem:[%s4376_s16 + $0xd0] sm:$0xff] }
  0xe5   : > { %v662_v1 = vsub.f32 1.0, %v630_v57  ;;  %v663_v2 = vsub.f32 1.0, %v631_v58  ;;  %3604 = vmatprep.subr.bf16.mxu0 %v3603_v61  ;;  %v551_v18 = vrot.slane %v481_v9, %v4406_v21  ;;  %v495_v19 = vrot.slane %v467_v10, %v4387_v7 }
  0xe6   : > { %v696_v5 = vmax.f32 %v664_v63, 0.0  ;;  %v697_v8 = vmax.f32 %v665_v0, 0.0  ;;  %3606 = vmatpush3.bf16.msra.mxu0 %v3603_v61  ;;  %3513 = vmatmul.mubr.msk.f32.vlgmr.msra.gmra.mrb[6].mxu1 %vm740_vm0, %v723_v62  ;;  %v634_v13 = vand.u32 2147483647, %v602_v16  ;;  %v635_v14 = vand.u32 2147483647, %v603_v31 }
  0xe7   : > { %v694_v11 = vmax.f32 %v662_v1, 0.0  ;;  %v695_v12 = vmax.f32 %v663_v2, 0.0  ;;  %3526 = vmatprep.mubr.msk.f32.mxu1 %vm740_vm0, %v726_v6  ;;  %v497_v20 = vcombine.high %v481_v9, %v481_v9  ;;  %v604_v28 = vsub.f32 %v551_v18, %v4411_v23 }
  0xe8   : > { %v3611_v15 = vpack.c.bf16 %v697_v8, %v696_v5  ;;  %v666_v24 = vsub.f32 1.0, %v634_v13  ;;  %v667_v25 = vsub.f32 1.0, %v635_v14  ;;  %v605_v29 = vsub.f32 %v551_v18, %v4416_v27  ;;  %v733_v5 = vld [vmem:[%s4376_s16 + $0xc8] sm:$0xf]  ;;  %v736_v13 = vld [vmem:[%s4376_s16 + $0xe0] sm:$0xff]  ;;  %v738_v14 = vld [vmem:[%s4376_s16 + $0xf0] sm:$0xff] }
  0xe9   : > { %v3607_v22 = vpack.c.bf16 %v695_v12, %v694_v11  ;;  %3520 = vmatmul.mubr.msk.f32.vlgmr.msra.gmra.mrb[8].mxu0 %vm740_vm0, %v725_v3  ;;  %v555_v30 = vrot.slane %v495_v19, %v4406_v21  ;;  %v559_v34 = vrot.slane %v497_v20, %v4406_v21  ;;  %v499_v35 = vcombine.high %v495_v19, %v495_v19  ;;  %v735_v11 = vld [vmem:[%s4376_s16 + $0xd8] sm:$0xf] }
  0xea   : > { %3612 = vmatprep.subr.bf16.mxu0 %v3611_v15  ;;  %v698_v7 = vmax.f32 %v666_v24, 0.0  ;;  %v699_v32 = vmax.f32 %v667_v25, 0.0  ;;  %3533 = vmatprep.mubr.msk.f32.mxu0 %vm740_vm0, %v728_v26  ;;  %v636_v38 = vand.u32 2147483647, %v604_v28  ;;  %v637_v39 = vand.u32 2147483647, %v605_v29 }
  0xeb   : > { %3608 = vmatprep.subr.bf16.mxu1 %v3607_v22  ;;  %3614 = vmatpush3.bf16.msra.mxu0 %v3611_v15  ;;  %v606_v40 = vsub.f32 %v555_v30, %v4411_v23  ;;  %v607_v41 = vsub.f32 %v555_v30, %v4416_v27  ;;  %v608_v46 = vsub.f32 %v559_v34, %v4411_v23  ;;  %v737_v15 = vld [vmem:[%s4376_s16 + $0xe8] sm:$0xf]  ;;  %v739_v18 = vld [vmem:[%s4376_s16 + $0xf8] sm:$0xf]  ;;  %v4005_v19 = vmov 1983009808  }
  0xec   : > { %3610 = vmatpush3.bf16.msra.mxu1 %v3607_v22  ;;  %v3615_v42 = vpack.c.bf16 %v699_v32, %v698_v7  ;;  %v609_v47 = vsub.f32 %v559_v34, %v4416_v27  ;;  %v563_v48 = vrot.slane %v499_v35, %v4406_v21  ;;  %v668_v49 = vsub.f32 1.0, %v636_v38  ;;  %v2037_v30 = vld [vmem:[%s4368_s14] sm:$0xff]  ;;  %v2038_v38 = vld [vmem:[%s4368_s14 + $0x8] sm:$0xff] }
  0xed   : > { %v669_v50 = vsub.f32 1.0, %v637_v39  ;;  %v638_v51 = vand.u32 2147483647, %v606_v40  ;;  %v639_v37 = vand.u32 2147483647, %v607_v41  ;;  %v2746_v20 = vunpack.c.l.s4 %v4005_v19 }
  0xee   : > { %3534 = vmatmul.mubr.msk.f32.vlgmr.msra.gmra.mrb[10].mxu0 %vm740_vm0, %v729_v33  ;;  %3616 = vmatprep.subr.bf16.mxu1 %v3615_v42  ;;  %v640_v53 = vand.u32 2147483647, %v608_v46  ;;  %v641_v54 = vand.u32 2147483647, %v609_v47  ;;  %v610_v55 = vsub.f32 %v563_v48, %v4411_v23  ;;  %v611_v56 = vsub.f32 %v563_v48, %v4416_v27 }
  0xef   : > { %3527 = vmatmul.mubr.msk.f32.vlgmr.msra.gmra.mrb[8].mxu1 %vm740_vm0, %v727_v36  ;;  %v700_v57 = vmax.f32 %v668_v49, 0.0  ;;  %v701_v21 = vmax.f32 %v669_v50, 0.0  ;;  %v670_v58 = vsub.f32 1.0, %v638_v51  ;;  %v671_v59 = vsub.f32 1.0, %v639_v37  ;;  %3547 = vmatprep.mubr.msk.f32.mxu0 %vm740_vm0, %v732_v45 }
  0xf0   : > { %3618 = vmatpush3.bf16.msra.mxu1 %v3615_v42  ;;  %3540 = vmatprep.mubr.msk.f32.mxu1 %vm740_vm0, %v730_v43  ;;  %v672_v61 = vsub.f32 1.0, %v640_v53  ;;  %v673_v62 = vsub.f32 1.0, %v641_v54  ;;  %v642_v63 = vand.u32 2147483647, %v610_v55  ;;  %v643_v0 = vand.u32 2147483647, %v611_v56 }
  0xf1   : > { %v3619_v1 = vpack.c.bf16 %v701_v21, %v700_v57  ;;  %v702_v2 = vmax.f32 %v670_v58, 0.0  ;;  %v703_v23 = vmax.f32 %v671_v59, 0.0  ;;  %v4006_v22 = vmov 1934713408   ;;  %v2039_v42 = vld [vmem:[%s4368_s14 + $0x10] sm:$0xff] }
  0xf2   : > { %v704_v27 = vmax.f32 %v672_v61, 0.0  ;;  %v705_v6 = vmax.f32 %v673_v62, 0.0  ;;  %v674_v16 = vsub.f32 1.0, %v642_v63  ;;  %v675_v31 = vsub.f32 1.0, %v643_v0 }
  0xf3   : > { %3541 = vmatmul.mubr.msk.f32.vlgmr.msra.gmra.mrb[10].mxu1 %vm740_vm0, %v731_v52  ;;  %3620 = vmatprep.subr.bf16.mxu0 %v3619_v1  ;;  %v3623_v3 = vpack.c.bf16 %v703_v23, %v702_v2  ;;  %v2779_v24 = vunpack.c.l.s4 %v4006_v22  ;;  %v4587_v25 = vmul.f32 0.5, %v4400_v17  ;;  %v2747_v26 = vunpack.c.0.s8 %v2746_v20 }
  0xf4   : > { %3554 = vmatprep.mubr.msk.f32.mxu1 %vm740_vm0, %v734_v60  ;;  %3622 = vmatpush3.bf16.msra.mxu0 %v3619_v1  ;;  %v3627_v8 = vpack.c.bf16 %v705_v6, %v704_v27  ;;  %v706_v9 = vmax.f32 %v674_v16, 0.0  ;;  %v707_v10 = vmax.f32 %v675_v31, 0.0  ;;  %v4590_v29 = vmul.f32 0.5, %v4485_v44 }
  0xf5   : > { %3624 = vmatprep.subr.bf16.mxu1 %v3623_v3  ;;  %v2780_v28 = vunpack.c.0.s8 %v2779_v24  ;;  %v4596_v33 = vrot.slane %v4587_v25, 1  ;;  %v4599_v34 = vsub.s32 %v2747_v26, %v4382_v4  ;;  %v4608_v44 = vrot.slane %v4587_v25, 2 }
  0xf6   : > { %3626 = vmatpush3.bf16.msra.mxu1 %v3623_v3  ;;  %3628 = vmatprep.subr.bf16.mxu0 %v3627_v8  ;;  %v3631_v12 = vpack.c.bf16 %v707_v10, %v706_v9  ;;  %v4611_v39 = vrot.slane %v4587_v25, 3  ;;  %v4614_v40 = vrot.slane %v4587_v25, 4  ;;  %v4618_v43 = vrot.slane %v4587_v25, 5 }
  0xf7   : > { %3548 = vmatmul.mubr.msk.f32.vlgmr.msra.gmra.mrb[12].mxu0 %vm740_vm0, %v733_v5  ;;  %v4602_v17 = vsub.s32 %v2780_v28, %v4382_v4  ;;  %v4621_v4 = vrot.slane %v4587_v25, 6  ;;  %v4624_v45 = vrot.slane %v4587_v25, 7  ;;  %v4627_v46 = vrot.slane %v4590_v29, 1 }
  0xf8   : > { %3630 = vmatpush3.bf16.msra.mxu0 %v3627_v8  ;;  %3632 = vmatprep.subr.bf16.mxu1 %v3631_v12  ;;  %v4635_v55 = vrot.slane %v4590_v29, 2 }
  0xf9   : > { %3555 = vmatmul.mubr.msk.f32.vlgmr.msra.gmra.mrb[12].mxu1 %vm740_vm0, %v735_v11  ;;  %3561 = vmatprep.mubr.msk.f32.mxu0 %vm740_vm0, %v736_v13 }
  0xfa   : > { %3634 = vmatpush3.bf16.msra.mxu1 %v3631_v12  ;;  %3568 = vmatprep.mubr.msk.f32.mxu1 %vm740_vm0, %v738_v14 }
  0xfb   : > { %3562 = vmatmul.mubr.msk.f32.vlgmr.msra.gmra.mrb[14].mxu0 %vm740_vm0, %v737_v15 }
  0xfd   : > { %3569 = vmatmul.mubr.msk.f32.vlgmr.msra.gmra.mrb[14].mxu1 %vm740_vm0, %v739_v18 }
 0x1a6   : > { %v4593_v7 = vpop.f32.mrb[0].mxu0 }
 0x1a7   : > { %v813_v32 = vpop.f32.mrb[1].mxu0 }
 0x1a8   : > { %v2053_v35 = vmul.f32 %v2037_v30, %v813_v32  ;;  %v4604_v36 = vpop.f32.mrb[0].mxu1 }
 0x1a9   : > { %v894_v41 = vpop.f32.mrb[1].mxu1 }
 0x1aa   : > { %v2070_v47 = vsel %vm2069_vm3, %v2053_v35, 0.0  ;;  %v2198_v48 = vrot.slane %v2053_v35, 2  ;;  %v2342_v49 = vrot.slane %v2053_v35, 4  ;;  %v2486_v50 = vrot.slane %v2053_v35, 6  ;;  %v4630_v51 = vpop.f32.mrb[2].mxu0 }
 0x1ab   : > { %v2071_v37 = vrot.slane %v2070_v47, 4  ;;  %v2054_v52 = vmul.f32 %v2038_v38, %v894_v41  ;;  %v2744_v53 = vcombine.low %v4593_v7, %v4630_v51  ;;  %v975_v54 = vpop.f32.mrb[3].mxu0 }
 0x1ac   : > { %v2230_v56 = vsel %vm2069_vm3, %v2198_v48, 0.0  ;;  %v2374_v57 = vsel %vm2069_vm3, %v2342_v49, 0.0  ;;  %v2518_v21 = vsel %vm2069_vm3, %v2486_v50, 0.0  ;;  %v4640_v58 = vmul.f32 %v2039_v42, %v975_v54  ;;  %v4642_v59 = vpop.f32.mrb[2].mxu1 }
 0x1ad   : > { %v2072_v60 = vadd.f32 %v2071_v37, %v2070_v47  ;;  %v2231_v61 = vrot.slane %v2230_v56, 4  ;;  %v2375_v62 = vrot.slane %v2374_v57, 4  ;;  %v2519_v63 = vrot.slane %v2518_v21, 4  ;;  %v4644_v0 = vpop.f32.mrb[3].mxu1 }
 0x1ae   : > { %v2077_v1 = vsel %vm2069_vm3, %v2054_v52, 0.0  ;;  %v2199_v2 = vrot.slane %v2054_v52, 2  ;;  %v2343_v23 = vrot.slane %v2054_v52, 4  ;;  %v2487_v27 = vrot.slane %v2054_v52, 6  ;;  %v4647_v6 = vpop.f32.mrb[4].mxu0 }
 0x1af   : > { %v2073_v16 = vrot.slane %v2072_v60, 2  ;;  %v2232_v31 = vadd.f32 %v2231_v61, %v2230_v56  ;;  %v2376_v3 = vadd.f32 %v2375_v62, %v2374_v57  ;;  %v2520_v5 = vadd.f32 %v2519_v63, %v2518_v21  ;;  %v4649_v8 = vpop.f32.mrb[5].mxu0 }
 0x1b0   : > { %v2078_v9 = vrot.slane %v2077_v1, 4  ;;  %v2237_v10 = vsel %vm2069_vm3, %v2199_v2, 0.0  ;;  %v2381_v11 = vsel %vm2069_vm3, %v2343_v23, 0.0  ;;  %v2525_v12 = vsel %vm2069_vm3, %v2487_v27, 0.0 }
 0x1b1   : > { %v2074_v13 = vadd.f32 %v2073_v16, %v2072_v60  ;;  %v2233_v14 = vrot.slane %v2232_v31, 2  ;;  %v2377_v15 = vrot.slane %v2376_v3, 2  ;;  %v2521_v18 = vrot.slane %v2520_v5, 2 }
 0x1b2   : > { %v2079_v19 = vadd.f32 %v2078_v9, %v2077_v1  ;;  %v2238_v20 = vrot.slane %v2237_v10, 4  ;;  %v2382_v22 = vrot.slane %v2381_v11, 4  ;;  %v2526_v24 = vrot.slane %v2525_v12, 4  ;;  %v4654_v26 = vpop.f32.mrb[4].mxu1 }
 0x1b3   : > { %v2075_v28 = vrot.slane %v2074_v13, 1  ;;  %v2234_v30 = vadd.f32 %v2233_v14, %v2232_v31  ;;  %v2378_v32 = vadd.f32 %v2377_v15, %v2376_v3  ;;  %v2522_v35 = vadd.f32 %v2521_v18, %v2520_v5  ;;  %v4656_v38 = vpop.f32.mrb[5].mxu1  ;;  %v4658_v41 = vpop.f32.mrb[6].mxu0 }
 0x1b4   : > { %v2080_v42 = vrot.slane %v2079_v19, 2  ;;  %v2239_v47 = vadd.f32 %v2238_v20, %v2237_v10  ;;  %v2383_v48 = vadd.f32 %v2382_v22, %v2381_v11  ;;  %v2527_v49 = vadd.f32 %v2526_v24, %v2525_v12  ;;  %v4660_v50 = vpop.f32.mrb[7].mxu0 }
 0x1b5   : > { %v2076_v37 = vadd.f32 %v2075_v28, %v2074_v13  ;;  %v2235_v52 = vrot.slane %v2234_v30, 1  ;;  %v2379_v54 = vrot.slane %v2378_v32, 1  ;;  %v2523_v56 = vrot.slane %v2522_v35, 1 }
 0x1b6   : > { %v2081_v57 = vadd.f32 %v2080_v42, %v2079_v19  ;;  %v2240_v21 = vrot.slane %v2239_v47, 2  ;;  %v2384_v60 = vrot.slane %v2383_v48, 2  ;;  %v2528_v61 = vrot.slane %v2527_v49, 2 }
 0x1b7   : > { %v2236_v62 = vadd.f32 %v2235_v52, %v2234_v30  ;;  %v2380_v63 = vadd.f32 %v2379_v54, %v2378_v32  ;;  %v2524_v1 = vadd.f32 %v2523_v56, %v2522_v35  ;;  %v2664_v2 = vmul.f32 %v4587_v25, %v2076_v37 }
 0x1b8   : > { %v2082_v23 = vrot.slane %v2081_v57, 1  ;;  %v2241_v27 = vadd.f32 %v2240_v21, %v2239_v47  ;;  %v2385_v16 = vadd.f32 %v2384_v60, %v2383_v48  ;;  %v2529_v31 = vadd.f32 %v2528_v61, %v2527_v49 }
 0x1b9   : > { %v2680_v3 = vmul.f32 %v4587_v25, %v2236_v62  ;;  %v2696_v5 = vmul.f32 %v4587_v25, %v2380_v63  ;;  %v2712_v9 = vmul.f32 %v4587_v25, %v2524_v1  ;;  %v4670_v10 = vrot.slane %v2744_v53, %v4599_v34  ;;  %v4672_v11 = vpop.f32.mrb[6].mxu1 }
 0x1ba   : > { %v2083_v12 = vadd.f32 %v2082_v23, %v2081_v57  ;;  %v2242_v13 = vrot.slane %v2241_v27, 1  ;;  %v2386_v14 = vrot.slane %v2385_v16, 1  ;;  %v2530_v15 = vrot.slane %v2529_v31, 1  ;;  %v4674_v18 = vpop.f32.mrb[7].mxu1 }
 0x1bb   : > { %v2084_v19 = vsel %vm2069_vm3, %v4640_v58, 0.0  ;;  %v2200_v20 = vrot.slane %v4640_v58, 2  ;;  %v2344_v25 = vrot.slane %v4640_v58, 4  ;;  %v2488_v22 = vrot.slane %v4640_v58, 6 }
 0x1bc   : > { %v2243_v7 = vadd.f32 %v2242_v13, %v2241_v27  ;;  %v2387_v51 = vadd.f32 %v2386_v14, %v2385_v16  ;;  %v2531_v53 = vadd.f32 %v2530_v15, %v2529_v31  ;;  %v2665_v24 = vmul.f32 %v4596_v33, %v2083_v12  ;;  %v4682_v28 = vpop.f32.mrb[8].mxu0  ;;  %v2041_v31 = vld [vmem:[%s4368_s14 + $0x20] sm:$0xff]  ;;  %v2042_v12 = vld [vmem:[%s4368_s14 + $0x28] sm:$0xff] }
 0x1bd   : > { %v2085_v30 = vrot.slane %v2084_v19, 4  ;;  %v2244_v32 = vsel %vm2069_vm3, %v2200_v20, 0.0  ;;  %v2388_v35 = vsel %vm2069_vm3, %v2344_v25, 0.0  ;;  %v2532_v42 = vsel %vm2069_vm3, %v2488_v22, 0.0  ;;  %v4687_v47 = vpop.f32.mrb[9].mxu0 }
 0x1be   : > { %v2681_v48 = vmul.f32 %v4596_v33, %v2243_v7  ;;  %v2697_v58 = vmul.f32 %v4596_v33, %v2387_v51  ;;  %v2713_v49 = vmul.f32 %v4596_v33, %v2531_v53  ;;  %v2944_v37 = vrot.slane %v2665_v24, 7  ;;  %v2040_v33 = vld [vmem:[%s4368_s14 + $0x18] sm:$0xff] }
 0x1bf   : > { %v2086_v52 = vadd.f32 %v2085_v30, %v2084_v19  ;;  %v2245_v54 = vrot.slane %v2244_v32, 4  ;;  %v2389_v56 = vrot.slane %v2388_v35, 4  ;;  %v2533_v57 = vrot.slane %v2532_v42, 4 }
 0x1c0   : > { %v4693_v21 = vsel %vm2945_vm4, %v2944_v37, %v2664_v2  ;;  %v2979_v60 = vrot.slane %v2681_v48, 7  ;;  %v3007_v61 = vrot.slane %v2697_v58, 7  ;;  %v3035_v62 = vrot.slane %v2713_v49, 7 }
 0x1c1   : > { %v4695_v63 = vpop.f32.mrb[10].mxu0  ;;  %v2087_v1 = vrot.slane %v2086_v52, 2  ;;  %v2246_v23 = vadd.f32 %v2245_v54, %v2244_v32  ;;  %v2390_v27 = vadd.f32 %v2389_v56, %v2388_v35  ;;  %v2534_v16 = vadd.f32 %v2533_v57, %v2532_v42 }
 0x1c2   : > { %v4700_v13 = vpop.f32.mrb[8].mxu1  ;;  %v4702_v14 = vpop.f32.mrb[11].mxu0  ;;  %v4705_v15 = vsel %vm2945_vm4, %v2979_v60, %v2680_v3  ;;  %v4708_v2 = vsel %vm2945_vm4, %v3007_v61, %v2696_v5  ;;  %v4711_v19 = vsel %vm2945_vm4, %v3035_v62, %v2712_v9  ;;  %v2752_v20 = vcombine.low %v4604_v36, %v4642_v59 }
 0x1c3   : > { %v4715_v25 = vpop.f32.mrb[9].mxu1  ;;  %v2088_v22 = vadd.f32 %v2087_v1, %v2086_v52  ;;  %v2247_v7 = vrot.slane %v2246_v23, 2  ;;  %v2391_v51 = vrot.slane %v2390_v27, 2  ;;  %v2535_v53 = vrot.slane %v2534_v16, 2 }
 0x1c4   : > { %v2759_v24 = vrot.slane %v2752_v20, %v4599_v34  ;;  %v2056_v3 = vmul.f32 %v2040_v33, %v4644_v0  ;;  %v4720_v5 = vmul.f32 %v2041_v31, %v4649_v8  ;;  %v4723_v9 = vmul.f32 %v2042_v12, %v4656_v38 }
 0x1c5   : > { %v2089_v30 = vrot.slane %v2088_v22, 1  ;;  %v2248_v32 = vadd.f32 %v2247_v7, %v2246_v23  ;;  %v2392_v35 = vadd.f32 %v2391_v51, %v2390_v27  ;;  %v2536_v36 = vadd.f32 %v2535_v53, %v2534_v16 }
 0x1c6   : > { %v4725_v59 = vpop.f32.mrb[10].mxu1  ;;  %v2776_v42 = vcombine.low %v4670_v10, %v2759_v24  ;;  %v2777_v48 = vcombine.high %v4670_v10, %v2759_v24  ;;  %v2091_v58 = vsel %vm2069_vm3, %v2056_v3, 0.0  ;;  %v2201_v49 = vrot.slane %v2056_v3, 2 }
 0x1c7   : > { %v4730_v0 = vpop.f32.mrb[11].mxu1  ;;  %v2090_v8 = vadd.f32 %v2089_v30, %v2088_v22  ;;  %v2249_v37 = vrot.slane %v2248_v32, 1  ;;  %v2393_v52 = vrot.slane %v2392_v35, 1  ;;  %v2537_v38 = vrot.slane %v2536_v36, 1 }
 0x1c8   : > { %v4733_v54 = vrot.slane %v2776_v42, %v4602_v17  ;;  %v4736_v56 = vrot.slane %v2777_v48, %v4602_v17  ;;  %v2092_v57 = vrot.slane %v2091_v58, 4  ;;  %v2251_v60 = vsel %vm2069_vm3, %v2201_v49, 0.0 }
 0x1c9   : > { %v2250_v61 = vadd.f32 %v2249_v37, %v2248_v32  ;;  %v2394_v10 = vadd.f32 %v2393_v52, %v2392_v35  ;;  %v2538_v62 = vadd.f32 %v2537_v38, %v2536_v36  ;;  %v2666_v1 = vmul.f32 %v4608_v44, %v2090_v8 }
 0x1ca   : > { %v2093_v23 = vadd.f32 %v2092_v57, %v2091_v58  ;;  %v2252_v27 = vrot.slane %v2251_v60, 4  ;;  %v2345_v16 = vrot.slane %v2056_v3, 4  ;;  %v2489_v33 = vrot.slane %v2056_v3, 6  ;;  %v4740_v31 = vpop.f32.mrb[12].mxu0 }
 0x1cb   : > { %5194 = vst [vmem:[#allocation26_spill] sm:$0xff] %v4740_v31  ;;  %v2682_v12 = vmul.f32 %v4608_v44, %v2250_v61  ;;  %v2698_v20 = vmul.f32 %v4608_v44, %v2394_v10  ;;  %v2714_v22 = vmul.f32 %v4608_v44, %v2538_v62  ;;  %v2947_v7 = vrot.slane %v2666_v1, 6  ;;  %v4745_v51 = vpop.f32.mrb[13].mxu0 }
 0x1cc   : > { %v2094_v53 = vrot.slane %v2093_v23, 2  ;;  %v2253_v24 = vadd.f32 %v2252_v27, %v2251_v60  ;;  %v2395_v30 = vsel %vm2069_vm3, %v2345_v16, 0.0  ;;  %v2539_v32 = vsel %vm2069_vm3, %v2489_v33, 0.0  ;;  %v4749_v35 = vpop.f32.mrb[12].mxu1 }
 0x1cd   : > { %5195 = vst [vmem:[#allocation27_spill] sm:$0xff] %v4749_v35  ;;  %v2949_v3 = vsel %vm2948_vm5, %v2947_v7, %v4693_v21  ;;  %v2981_v36 = vrot.slane %v2682_v12, 6  ;;  %v3009_v42 = vrot.slane %v2698_v20, 6  ;;  %v3037_v48 = vrot.slane %v2714_v22, 6  ;;  %v4753_v58 = vpop.f32.mrb[13].mxu1 }
 0x1ce   : > { %v2095_v44 = vadd.f32 %v2094_v53, %v2093_v23  ;;  %v2254_v49 = vrot.slane %v2253_v24, 2  ;;  %v2396_v8 = vrot.slane %v2395_v30, 4  ;;  %v2540_v37 = vrot.slane %v2539_v32, 4  ;;  %v4755_v52 = vpop.f32.mrb[14].mxu0 }
 0x1cf   : > { %v2982_v38 = vsel %vm2948_vm5, %v2981_v36, %v4705_v15  ;;  %v4761_v57 = vsel %vm2948_vm5, %v3009_v42, %v4708_v2  ;;  %v4765_v21 = vsel %vm2948_vm5, %v3037_v48, %v4711_v19  ;;  %v2098_v60 = vsel %vm2069_vm3, %v4720_v5, 0.0  ;;  %v4769_v61 = vpop.f32.mrb[15].mxu0 }
 0x1d0   : > { %5196 = vst [vmem:[#allocation28_spill] sm:$0xff] %v4769_v61  ;;  %v2096_v10 = vrot.slane %v2095_v44, 1  ;;  %v2255_v62 = vadd.f32 %v2254_v49, %v2253_v24  ;;  %v2397_v1 = vadd.f32 %v2396_v8, %v2395_v30  ;;  %v2541_v23 = vadd.f32 %v2540_v37, %v2539_v32  ;;  %v4771_v27 = vpop.f32.mrb[14].mxu1 }
 0x1d1   : > { %5197 = vst [vmem:[#allocation29_spill] sm:$0xff] %v4771_v27  ;;  %v2099_v15 = vrot.slane %v2098_v60, 4  ;;  %v2202_v16 = vrot.slane %v4720_v5, 2  ;;  %v2346_v2 = vrot.slane %v4720_v5, 4  ;;  %v2490_v33 = vrot.slane %v4720_v5, 6  ;;  %v4776_v19 = vpop.f32.mrb[15].mxu1 }
 0x1d2   : > { %5198 = vst [vmem:[#allocation30_spill] sm:$0xff] %v4776_v19  ;;  %v2097_v12 = vadd.f32 %v2096_v10, %v2095_v44  ;;  %v2256_v20 = vrot.slane %v2255_v62, 1  ;;  %v2398_v22 = vrot.slane %v2397_v1, 2  ;;  %v2542_v7 = vrot.slane %v2541_v23, 2 }
 0x1d3   : > { %v2100_v53 = vadd.f32 %v2099_v15, %v2098_v60  ;;  %v2258_v24 = vsel %vm2069_vm3, %v2202_v16, 0.0  ;;  %v2402_v30 = vsel %vm2069_vm3, %v2346_v2, 0.0  ;;  %v2546_v32 = vsel %vm2069_vm3, %v2490_v33, 0.0 }
 0x1d4   : > { %v2257_v36 = vadd.f32 %v2256_v20, %v2255_v62  ;;  %v2399_v42 = vadd.f32 %v2398_v22, %v2397_v1  ;;  %v2543_v48 = vadd.f32 %v2542_v7, %v2541_v23  ;;  %v2667_v49 = vmul.f32 %v4611_v39, %v2097_v12 }
 0x1d5   : > { %v2101_v8 = vrot.slane %v2100_v53, 2  ;;  %v2259_v5 = vrot.slane %v2258_v24, 4  ;;  %v2403_v37 = vrot.slane %v2402_v30, 4  ;;  %v2547_v19 = vrot.slane %v2546_v32, 4 }
 0x1d6   : > { %v2400_v44 = vrot.slane %v2399_v42, 1  ;;  %v2544_v10 = vrot.slane %v2543_v48, 1  ;;  %v2683_v35 = vmul.f32 %v4611_v39, %v2257_v36  ;;  %v2950_v60 = vrot.slane %v2667_v49, 5 }
 0x1d7   : > { %v2102_v15 = vadd.f32 %v2101_v8, %v2100_v53  ;;  %v2260_v16 = vadd.f32 %v2259_v5, %v2258_v24  ;;  %v2404_v2 = vadd.f32 %v2403_v37, %v2402_v30  ;;  %v2548_v27 = vadd.f32 %v2547_v19, %v2546_v32 }
 0x1d8   : > { %v2401_v33 = vadd.f32 %v2400_v44, %v2399_v42  ;;  %v2545_v62 = vadd.f32 %v2544_v10, %v2543_v48  ;;  %v2952_v1 = vsel %vm2951_vm6, %v2950_v60, %v2949_v3  ;;  %v2983_v23 = vrot.slane %v2683_v35, 5 }
 0x1d9   : > { %v2103_v12 = vrot.slane %v2102_v15, 1  ;;  %v2261_v20 = vrot.slane %v2260_v16, 2  ;;  %v2405_v22 = vrot.slane %v2404_v2, 2  ;;  %v2549_v7 = vrot.slane %v2548_v27, 2 }
 0x1da   : > { %v2699_v61 = vmul.f32 %v4611_v39, %v2401_v33  ;;  %v2715_v31 = vmul.f32 %v4611_v39, %v2545_v62  ;;  %v2984_v36 = vsel %vm2951_vm6, %v2983_v23, %v2982_v38  ;;  %v2105_v53 = vsel %vm2069_vm3, %v4723_v9, 0.0 }
 0x1db   : > { %v2104_v24 = vadd.f32 %v2103_v12, %v2102_v15  ;;  %v2262_v19 = vadd.f32 %v2261_v20, %v2260_v16  ;;  %v2406_v30 = vadd.f32 %v2405_v22, %v2404_v2  ;;  %v2550_v32 = vadd.f32 %v2549_v7, %v2548_v27 }
 0x1dc   : > { %v3011_v42 = vrot.slane %v2699_v61, 5  ;;  %v3039_v3 = vrot.slane %v2715_v31, 5  ;;  %v2106_v35 = vrot.slane %v2105_v53, 4  ;;  %v2203_v48 = vrot.slane %v4723_v9, 2 }
 0x1dd   : > { %v2263_v49 = vrot.slane %v2262_v19, 1  ;;  %v2407_v8 = vrot.slane %v2406_v30, 1  ;;  %v2551_v5 = vrot.slane %v2550_v32, 1  ;;  %v2668_v37 = vmul.f32 %v4614_v40, %v2104_v24 }
 0x1de   : > { %v3012_v39 = vsel %vm2951_vm6, %v3011_v42, %v4761_v57  ;;  %v3040_v38 = vsel %vm2951_vm6, %v3039_v3, %v4765_v21  ;;  %v2107_v44 = vadd.f32 %v2106_v35, %v2105_v53  ;;  %v2265_v10 = vsel %vm2069_vm3, %v2203_v48, 0.0  ;;  %v2043_v3 = vld [vmem:[%s4368_s14 + $0x30] sm:$0xff] }
 0x1df   : > { %v2264_v27 = vadd.f32 %v2263_v49, %v2262_v19  ;;  %v2408_v61 = vadd.f32 %v2407_v8, %v2406_v30  ;;  %v2552_v31 = vadd.f32 %v2551_v5, %v2550_v32  ;;  %v2953_v60 = vrot.slane %v2668_v37, 4  ;;  %v2045_v5 = vld [vmem:[%s4368_s14 + $0x40] sm:$0xff] }
 0x1e0   : > { %v2108_v15 = vrot.slane %v2107_v44, 2  ;;  %v2266_v16 = vrot.slane %v2265_v10, 4  ;;  %v2347_v2 = vrot.slane %v4723_v9, 4  ;;  %v2491_v33 = vrot.slane %v4723_v9, 6 }
 0x1e1   : > { %v2684_v62 = vmul.f32 %v4614_v40, %v2264_v27  ;;  %v2700_v57 = vmul.f32 %v4614_v40, %v2408_v61  ;;  %v2716_v21 = vmul.f32 %v4614_v40, %v2552_v31  ;;  %v2955_v23 = vsel %vm2954_vm7, %v2953_v60, %v2952_v1  ;;  %v2044_v1 = vld [vmem:[%s4368_s14 + $0x38] sm:$0xff] }
 0x1e2   : > { %v2109_v12 = vadd.f32 %v2108_v15, %v2107_v44  ;;  %v2267_v20 = vadd.f32 %v2266_v16, %v2265_v10  ;;  %v2409_v22 = vsel %vm2069_vm3, %v2347_v2, 0.0  ;;  %v2553_v7 = vsel %vm2069_vm3, %v2491_v33, 0.0 }
 0x1e3   : > { %v2985_v53 = vrot.slane %v2684_v62, 4  ;;  %v3013_v9 = vrot.slane %v2700_v57, 4  ;;  %v3041_v24 = vrot.slane %v2716_v21, 4  ;;  %v2410_v19 = vrot.slane %v2409_v22, 4 }
 0x1e4   : > { %v2110_v30 = vrot.slane %v2109_v12, 1  ;;  %v2268_v32 = vrot.slane %v2267_v20, 2  ;;  %v2554_v42 = vrot.slane %v2553_v7, 4  ;;  %v2760_v40 = vcombine.low %v4647_v6, %v4658_v41 }
 0x1e5   : > { %v2986_v35 = vsel %vm2954_vm7, %v2985_v53, %v2984_v36  ;;  %v3014_v48 = vsel %vm2954_vm7, %v3013_v9, %v3012_v39  ;;  %v3042_v49 = vsel %vm2954_vm7, %v3041_v24, %v3040_v38  ;;  %v2411_v8 = vadd.f32 %v2410_v19, %v2409_v22 }
 0x1e6   : > { %v2111_v37 = vadd.f32 %v2110_v30, %v2109_v12  ;;  %v2269_v44 = vadd.f32 %v2268_v32, %v2267_v20  ;;  %v2555_v10 = vadd.f32 %v2554_v42, %v2553_v7  ;;  %v2767_v27 = vrot.slane %v2760_v40, %v4599_v34 }
 0x1e7   : > { %v2412_v61 = vrot.slane %v2411_v8, 2  ;;  %v2059_v31 = vmul.f32 %v2043_v3, %v4660_v50  ;;  %v2768_v6 = vcombine.low %v4654_v26, %v4672_v11  ;;  %v4817_v41 = vmul.f32 %v2044_v1, %v4674_v18 }
 0x1e8   : > { %v2270_v36 = vrot.slane %v2269_v44, 1  ;;  %v2556_v39 = vrot.slane %v2555_v10, 2  ;;  %v2669_v38 = vmul.f32 %v4618_v43, %v2111_v37  ;;  %v4821_v60 = vmul.f32 %v2045_v5, %v4687_v47 }
 0x1e9   : > { %v2413_v15 = vadd.f32 %v2412_v61, %v2411_v8  ;;  %v2112_v16 = vsel %vm2069_vm3, %v2059_v31, 0.0  ;;  %v2204_v2 = vrot.slane %v2059_v31, 2  ;;  %v2348_v33 = vrot.slane %v2059_v31, 4 }
 0x1ea   : > { %v2271_v62 = vadd.f32 %v2270_v36, %v2269_v44  ;;  %v2557_v50 = vadd.f32 %v2556_v39, %v2555_v10  ;;  %v2956_v57 = vrot.slane %v2669_v38, 3  ;;  %v2113_v21 = vrot.slane %v2112_v16, 4 }
 0x1eb   : > { %v2414_v26 = vrot.slane %v2413_v15, 1  ;;  %v2272_v11 = vsel %vm2069_vm3, %v2204_v2, 0.0  ;;  %v2416_v18 = vsel %vm2069_vm3, %v2348_v33, 0.0  ;;  %v2492_v12 = vrot.slane %v2059_v31, 6 }
 0x1ec   : > { %v2558_v20 = vrot.slane %v2557_v50, 1  ;;  %v2685_v22 = vmul.f32 %v4618_v43, %v2271_v62  ;;  %v2958_v47 = vsel %vm2957_vm8, %v2956_v57, %v2955_v23  ;;  %v2114_v7 = vadd.f32 %v2113_v21, %v2112_v16 }
 0x1ed   : > { %v2415_v53 = vadd.f32 %v2414_v26, %v2413_v15  ;;  %v2273_v9 = vrot.slane %v2272_v11, 4  ;;  %v2417_v24 = vrot.slane %v2416_v18, 4  ;;  %v2560_v19 = vsel %vm2069_vm3, %v2492_v12, 0.0 }
 0x1ee   : > { %v2559_v30 = vadd.f32 %v2558_v20, %v2557_v50  ;;  %v2987_v32 = vrot.slane %v2685_v22, 3  ;;  %v2115_v42 = vrot.slane %v2114_v7, 2  ;;  %v2561_v40 = vrot.slane %v2560_v19, 4 }
 0x1ef   : > { %v2701_v3 = vmul.f32 %v4618_v43, %v2415_v53  ;;  %v2274_v1 = vadd.f32 %v2273_v9, %v2272_v11  ;;  %v2418_v8 = vadd.f32 %v2417_v24, %v2416_v18  ;;  %v2775_v5 = vrot.slane %v2768_v6, %v4599_v34 }
 0x1f0   : > { %v2717_v37 = vmul.f32 %v4618_v43, %v2559_v30  ;;  %v2988_v23 = vsel %vm2957_vm8, %v2987_v32, %v2986_v35  ;;  %v2116_v44 = vadd.f32 %v2115_v42, %v2114_v7  ;;  %v2562_v10 = vadd.f32 %v2561_v40, %v2560_v19 }
 0x1f1   : > { %v3015_v61 = vrot.slane %v2701_v3, 3  ;;  %v2275_v31 = vrot.slane %v2274_v1, 2  ;;  %v2419_v36 = vrot.slane %v2418_v8, 2  ;;  %v2792_v39 = vcombine.low %v2767_v27, %v2775_v5 }
 0x1f2   : > { %v3043_v38 = vrot.slane %v2717_v37, 3  ;;  %v2117_v15 = vrot.slane %v2116_v44, 1  ;;  %v2563_v16 = vrot.slane %v2562_v10, 2  ;;  %v2793_v2 = vcombine.high %v2767_v27, %v2775_v5 }
 0x1f3   : > { %v3016_v33 = vsel %vm2957_vm8, %v3015_v61, %v3014_v48  ;;  %v2276_v62 = vadd.f32 %v2275_v31, %v2274_v1  ;;  %v2420_v50 = vadd.f32 %v2419_v36, %v2418_v8  ;;  %v2800_v6 = vrot.slane %v2792_v39, %v4602_v17 }
 0x1f4   : > { %v3044_v43 = vsel %vm2957_vm8, %v3043_v38, %v3042_v49  ;;  %v2118_v35 = vadd.f32 %v2117_v15, %v2116_v44  ;;  %v2564_v57 = vadd.f32 %v2563_v16, %v2562_v10  ;;  %v2807_v21 = vrot.slane %v2793_v2, %v4602_v17 }
 0x1f5   : > { %v2277_v26 = vrot.slane %v2276_v62, 1  ;;  %v2421_v11 = vrot.slane %v2420_v50, 1  ;;  %v2808_v27 = vcombine.low %v4733_v54, %v2800_v6  ;;  %v2809_v48 = vcombine.high %v4733_v54, %v2800_v6 }
 0x1f6   : > { %v2565_v18 = vrot.slane %v2564_v57, 1  ;;  %v2670_v12 = vmul.f32 %v4621_v4, %v2118_v35  ;;  %v2810_v20 = vcombine.low %v4736_v56, %v2807_v21  ;;  %v2811_v22 = vcombine.high %v4736_v56, %v2807_v21 }
 0x1f7   : > { %v2278_v49 = vadd.f32 %v2277_v26, %v2276_v62  ;;  %v2422_v7 = vadd.f32 %v2421_v11, %v2420_v50  ;;  %3380 = vst.msk [vmem:[%s4419_s11 + $0x80] sm:$0xff] %vm740_vm0, %v2808_v27  ;;  %3382 = vst.msk [vmem:[%s4419_s11 + $0x90] sm:$0xff] %vm740_vm0, %v2809_v48  ;;  %v2119_v53 = vsel %vm2069_vm3, %v4817_v41, 0.0  ;;  %v2205_v9 = vrot.slane %v4817_v41, 2 }
 0x1f8   : > { %v2566_v24 = vadd.f32 %v2565_v18, %v2564_v57  ;;  %v2959_v54 = vrot.slane %v2670_v12, 2  ;;  %3384 = vst.msk [vmem:[%s4419_s11 + $0xa0] sm:$0xff] %vm740_vm0, %v2810_v20  ;;  %3386 = vst.msk [vmem:[%s4419_s11 + $0xb0] sm:$0xff] %vm740_vm0, %v2811_v22  ;;  %v2120_v19 = vrot.slane %v2119_v53, 4  ;;  %v2349_v56 = vrot.slane %v4817_v41, 4 }
 0x1f9   : > { %v2686_v30 = vmul.f32 %v4621_v4, %v2278_v49  ;;  %v2702_v32 = vmul.f32 %v4621_v4, %v2422_v7  ;;  %v2279_v42 = vsel %vm2069_vm3, %v2205_v9, 0.0  ;;  %v2493_v40 = vrot.slane %v4817_v41, 6 }
 0x1fa   : > { %v2718_v3 = vmul.f32 %v4621_v4, %v2566_v24  ;;  %v2961_v1 = vsel %vm2960_vm9, %v2959_v54, %v2958_v47  ;;  %v2121_v8 = vadd.f32 %v2120_v19, %v2119_v53  ;;  %v2280_v5 = vrot.slane %v2279_v42, 4 }
 0x1fb   : > { %v2989_v37 = vrot.slane %v2686_v30, 2  ;;  %v3017_v44 = vrot.slane %v2702_v32, 2  ;;  %v2423_v10 = vsel %vm2069_vm3, %v2349_v56, 0.0  ;;  %v2567_v61 = vsel %vm2069_vm3, %v2493_v40, 0.0 }
 0x1fc   : > { %v3045_v31 = vrot.slane %v2718_v3, 2  ;;  %v2122_v36 = vrot.slane %v2121_v8, 2  ;;  %v2281_v39 = vadd.f32 %v2280_v5, %v2279_v42  ;;  %v2424_v38 = vrot.slane %v2423_v10, 4 }
 0x1fd   : > { %v2990_v15 = vsel %vm2960_vm9, %v2989_v37, %v2988_v23  ;;  %v4864_v41 = vsel %vm2960_vm9, %v3017_v44, %v3016_v33  ;;  %v2568_v4 = vrot.slane %v2567_v61, 4  ;;  %v2126_v47 = vsel %vm2069_vm3, %v4821_v60, 0.0 }
 0x1fe   : > { %v4869_v16 = vsel %vm2960_vm9, %v3045_v31, %v3044_v43  ;;  %v2123_v2 = vadd.f32 %v2122_v36, %v2121_v8  ;;  %v2282_v62 = vrot.slane %v2281_v39, 2  ;;  %v2425_v50 = vadd.f32 %v2424_v38, %v2423_v10  ;;  %v2046_v36 = vld [vmem:[%s4368_s14 + $0x48] sm:$0xff] }
 0x1ff   : > { %v2569_v6 = vadd.f32 %v2568_v4, %v2567_v61  ;;  %v2127_v35 = vrot.slane %v2126_v47, 4  ;;  %v2206_v57 = vrot.slane %v4821_v60, 2  ;;  %v2350_v23 = vrot.slane %v4821_v60, 4 }
 0x200   : > { %v2124_v21 = vrot.slane %v2123_v2, 1  ;;  %v2283_v33 = vadd.f32 %v2282_v62, %v2281_v39  ;;  %v2426_v26 = vrot.slane %v2425_v50, 2  ;;  %v2494_v11 = vrot.slane %v4821_v60, 6 }
 0x201   : > { %v2570_v27 = vrot.slane %v2569_v6, 2  ;;  %v2128_v48 = vadd.f32 %v2127_v35, %v2126_v47  ;;  %v2286_v18 = vsel %vm2069_vm3, %v2206_v57, 0.0  ;;  %v2430_v43 = vsel %vm2069_vm3, %v2350_v23, 0.0 }
 0x202   : > { %v2125_v12 = vadd.f32 %v2124_v21, %v2123_v2  ;;  %v2284_v20 = vrot.slane %v2283_v33, 1  ;;  %v2427_v22 = vadd.f32 %v2426_v26, %v2425_v50  ;;  %v2287_v49 = vrot.slane %v2286_v18, 4 }
 0x203   : > { %v2571_v7 = vadd.f32 %v2570_v27, %v2569_v6  ;;  %v2129_v53 = vrot.slane %v2128_v48, 2  ;;  %v2431_v9 = vrot.slane %v2430_v43, 4  ;;  %v2574_v24 = vsel %vm2069_vm3, %v2494_v11, 0.0 }
 0x204   : > { %v2285_v54 = vadd.f32 %v2284_v20, %v2283_v33  ;;  %v2428_v19 = vrot.slane %v2427_v22, 1  ;;  %v2671_v60 = vmul.f32 %v4624_v45, %v2125_v12  ;;  %v2288_v56 = vadd.f32 %v2287_v49, %v2286_v18  ;;  %v2047_v20 = vld [vmem:[%s4368_s14 + $0x50] sm:$0xff] }
 0x205   : > { %v2572_v30 = vrot.slane %v2571_v7, 1  ;;  %v2130_v32 = vadd.f32 %v2129_v53, %v2128_v48  ;;  %v2432_v42 = vadd.f32 %v2431_v9, %v2430_v43  ;;  %v2575_v40 = vrot.slane %v2574_v24, 4 }
 0x206   : > { %v2429_v3 = vadd.f32 %v2428_v19, %v2427_v22  ;;  %v2687_v8 = vmul.f32 %v4624_v45, %v2285_v54  ;;  %v2962_v5 = vrot.slane %v2671_v60, 1  ;;  %v2289_v37 = vrot.slane %v2288_v56, 2 }
 0x207   : > { %v2573_v44 = vadd.f32 %v2572_v30, %v2571_v7  ;;  %v2131_v10 = vrot.slane %v2130_v32, 1  ;;  %v2433_v61 = vrot.slane %v2432_v42, 2  ;;  %v2576_v31 = vadd.f32 %v2575_v40, %v2574_v24 }
 0x208   : > { %v2703_v39 = vmul.f32 %v4624_v45, %v2429_v3  ;;  %v2964_v38 = vsel %vm2963_vm10, %v2962_v5, %v2961_v1  ;;  %v2991_v4 = vrot.slane %v2687_v8, 1  ;;  %v2290_v47 = vadd.f32 %v2289_v37, %v2288_v56 }
 0x209   : > { %v2719_v2 = vmul.f32 %v4624_v45, %v2573_v44  ;;  %3071 = vst.msk [vmem:[%s4419_s11] sm:$0xff] %vm740_vm0, %v2964_v38  ;;  %v2132_v62 = vadd.f32 %v2131_v10, %v2130_v32  ;;  %v2434_v50 = vadd.f32 %v2433_v61, %v2432_v42  ;;  %v2577_v6 = vrot.slane %v2576_v31, 2 }
 0x20a   : > { %v2992_v35 = vsel %vm2963_vm10, %v2991_v4, %v2990_v15  ;;  %v3019_v57 = vrot.slane %v2703_v39, 1  ;;  %v2291_v23 = vrot.slane %v2290_v47, 1  ;;  %v2062_v21 = vmul.f32 %v2046_v36, %v4715_v25 }
 0x20b   : > { %v3047_v33 = vrot.slane %v2719_v2, 1  ;;  %3073 = vst.msk [vmem:[%s4419_s11 + $0x10] sm:$0xff] %vm740_vm0, %v2992_v35  ;;  %v2435_v1 = vrot.slane %v2434_v50, 1  ;;  %v2578_v26 = vadd.f32 %v2577_v6, %v2576_v31  ;;  %v4890_v45 = vmul.f32 %v4590_v29, %v2132_v62 }
 0x20c   : > { %v3020_v11 = vsel %vm2963_vm10, %v3019_v57, %v4864_v41  ;;  %v2292_v27 = vadd.f32 %v2291_v23, %v2290_v47  ;;  %v2133_v15 = vsel %vm2069_vm3, %v2062_v21, 0.0  ;;  %v2207_v48 = vrot.slane %v2062_v21, 2 }
 0x20d   : > { %v3048_v18 = vsel %vm2963_vm10, %v3047_v33, %v4869_v16  ;;  %3075 = vst.msk [vmem:[%s4419_s11 + $0x20] sm:$0xff] %vm740_vm0, %v3020_v11  ;;  %v2436_v25 = vadd.f32 %v2435_v1, %v2434_v50  ;;  %v2579_v43 = vrot.slane %v2578_v26, 1  ;;  %v2134_v12 = vrot.slane %v2133_v15, 4 }
 0x20e   : > { %3077 = vst.msk [vmem:[%s4419_s11 + $0x30] sm:$0xff] %vm740_vm0, %v3048_v18  ;;  %v4903_v22 = vmul.f32 %v4590_v29, %v2292_v27  ;;  %v2293_v41 = vsel %vm2069_vm3, %v2207_v48, 0.0  ;;  %v2351_v49 = vrot.slane %v2062_v21, 4  ;;  %v2495_v7 = vrot.slane %v2062_v21, 6 }
 0x20f   : > { %v2580_v53 = vadd.f32 %v2579_v43, %v2578_v26  ;;  %v4907_v9 = vmul.f32 %v4590_v29, %v2436_v25  ;;  %v2135_v16 = vadd.f32 %v2134_v12, %v2133_v15  ;;  %v2294_v24 = vrot.slane %v2293_v41, 4 }
 0x210   : > { %v2437_v54 = vsel %vm2069_vm3, %v2351_v49, 0.0  ;;  %v2581_v19 = vsel %vm2069_vm3, %v2495_v7, 0.0  ;;  %v2812_v60 = vcombine.low %v4682_v28, %v4695_v63  ;;  %v2063_v56 = vmul.f32 %v2047_v20, %v4702_v14 }
 0x211   : > { %v4915_v30 = vmul.f32 %v4590_v29, %v2580_v53  ;;  %v2136_v32 = vrot.slane %v2135_v16, 2  ;;  %v2295_v42 = vadd.f32 %v2294_v24, %v2293_v41  ;;  %v2438_v40 = vrot.slane %v2437_v54, 4 }
 0x212   : > { %v2582_v3 = vrot.slane %v2581_v19, 4  ;;  %v4918_v8 = vrot.slane %v2812_v60, %v4599_v34  ;;  %v2140_v5 = vsel %vm2069_vm3, %v2063_v56, 0.0  ;;  %v2208_v37 = vrot.slane %v2063_v56, 2 }
 0x213   : > { %v2137_v44 = vadd.f32 %v2136_v32, %v2135_v16  ;;  %v2296_v10 = vrot.slane %v2295_v42, 2  ;;  %v2439_v61 = vadd.f32 %v2438_v40, %v2437_v54  ;;  %v2141_v31 = vrot.slane %v2140_v5, 4 }
 0x214   : > { %v2583_v28 = vadd.f32 %v2582_v3, %v2581_v19  ;;  %v2300_v63 = vsel %vm2069_vm3, %v2208_v37, 0.0  ;;  %v2352_v14 = vrot.slane %v2063_v56, 4  ;;  %v2496_v36 = vrot.slane %v2063_v56, 6 }
 0x215   : > { %v2138_v39 = vrot.slane %v2137_v44, 1  ;;  %v2297_v38 = vadd.f32 %v2296_v10, %v2295_v42  ;;  %v2440_v4 = vrot.slane %v2439_v61, 2  ;;  %v2142_v47 = vadd.f32 %v2141_v31, %v2140_v5 }
 0x216   : > { %v2584_v2 = vrot.slane %v2583_v28, 2  ;;  %v2301_v62 = vrot.slane %v2300_v63, 4  ;;  %v2444_v50 = vsel %vm2069_vm3, %v2352_v14, 0.0  ;;  %v2588_v6 = vsel %vm2069_vm3, %v2496_v36, 0.0 }
 0x217   : > { %v2139_v35 = vadd.f32 %v2138_v39, %v2137_v44  ;;  %v2298_v57 = vrot.slane %v2297_v38, 1  ;;  %v2441_v23 = vadd.f32 %v2440_v4, %v2439_v61  ;;  %v2143_v21 = vrot.slane %v2142_v47, 2  ;;  %v2048_v44 = vld [vmem:[%s4368_s14 + $0x58] sm:$0xff] }
 0x218   : > { %v2585_v33 = vadd.f32 %v2584_v2, %v2583_v28  ;;  %v2302_v1 = vadd.f32 %v2301_v62, %v2300_v63  ;;  %v2445_v26 = vrot.slane %v2444_v50, 4  ;;  %v2589_v11 = vrot.slane %v2588_v6, 4 }
 0x219   : > { %v2299_v27 = vadd.f32 %v2298_v57, %v2297_v38  ;;  %v2442_v15 = vrot.slane %v2441_v23, 1  ;;  %v2673_v48 = vmul.f32 %v4627_v46, %v2139_v35  ;;  %v2144_v18 = vadd.f32 %v2143_v21, %v2142_v47 }
 0x21a   : > { %v2586_v25 = vrot.slane %v2585_v33, 1  ;;  %v2303_v43 = vrot.slane %v2302_v1, 2  ;;  %v2446_v12 = vadd.f32 %v2445_v26, %v2444_v50  ;;  %v2590_v20 = vadd.f32 %v2589_v11, %v2588_v6 }
 0x21b   : > { %v2443_v41 = vadd.f32 %v2442_v15, %v2441_v23  ;;  %v2689_v49 = vmul.f32 %v4627_v46, %v2299_v27  ;;  %v2965_v7 = vrot.slane %v2673_v48, 7  ;;  %v2145_v53 = vrot.slane %v2144_v18, 1  ;;  %v2049_v27 = vld [vmem:[%s4368_s14 + $0x60] sm:$0xff] }
 0x21c   : > { %v2587_v16 = vadd.f32 %v2586_v25, %v2585_v33  ;;  %v2304_v24 = vadd.f32 %v2303_v43, %v2302_v1  ;;  %v2447_v54 = vrot.slane %v2446_v12, 2  ;;  %v2591_v19 = vrot.slane %v2590_v20, 2  ;;  %v2050_v25 = vld [vmem:[%s4368_s14 + $0x68] sm:$0xff] }
 0x21d   : > { %v2705_v60 = vmul.f32 %v4627_v46, %v2443_v41  ;;  %v2966_v56 = vsel %vm2945_vm4, %v2965_v7, %v4890_v45  ;;  %v2993_v32 = vrot.slane %v2689_v49, 7  ;;  %v2146_v42 = vadd.f32 %v2145_v53, %v2144_v18 }
 0x21e   : > { %v2721_v40 = vmul.f32 %v4627_v46, %v2587_v16  ;;  %v2305_v3 = vrot.slane %v2304_v24, 1  ;;  %v2448_v5 = vadd.f32 %v2447_v54, %v2446_v12  ;;  %v2592_v37 = vadd.f32 %v2591_v19, %v2590_v20 }
 0x21f   : > { %v2994_v10 = vsel %vm2945_vm4, %v2993_v32, %v4903_v22  ;;  %v3021_v61 = vrot.slane %v2705_v60, 7  ;;  %v2674_v31 = vmul.f32 %v4635_v55, %v2146_v42  ;;  %v2820_v28 = vcombine.low %v4700_v13, %v4725_v59 }
 0x220   : > { %v3049_v63 = vrot.slane %v2721_v40, 7  ;;  %v2306_v14 = vadd.f32 %v2305_v3, %v2304_v24  ;;  %v2449_v45 = vrot.slane %v2448_v5, 1  ;;  %v2593_v36 = vrot.slane %v2592_v37, 1 }
 0x221   : > { %v3022_v46 = vsel %vm2945_vm4, %v3021_v61, %v4907_v9  ;;  %v2967_v39 = vrot.slane %v2674_v31, 6  ;;  %v2827_v38 = vrot.slane %v2820_v28, %v4599_v34  ;;  %v2064_v4 = vmul.f32 %v2048_v44, %v4730_v0 }
 0x222   : > { %v3050_v22 = vsel %vm2945_vm4, %v3049_v63, %v4915_v30  ;;  %v2450_v47 = vadd.f32 %v2449_v45, %v2448_v5  ;;  %v2594_v2 = vadd.f32 %v2593_v36, %v2592_v37  ;;  %v2690_v62 = vmul.f32 %v4635_v55, %v2306_v14 }
 0x223   : > { %v4944_v13 = vsel %vm2948_vm5, %v2967_v39, %v2966_v56  ;;  %v2844_v59 = vcombine.low %v4918_v8, %v2827_v38  ;;  %v2845_v9 = vcombine.high %v4918_v8, %v2827_v38  ;;  %v2147_v50 = vsel %vm2069_vm3, %v2064_v4, 0.0 }
 0x224   : > { %v2706_v6 = vmul.f32 %v4635_v55, %v2450_v47  ;;  %v2722_v0 = vmul.f32 %v4635_v55, %v2594_v2  ;;  %v2995_v30 = vrot.slane %v2690_v62, 6  ;;  %v2148_v35 = vrot.slane %v2147_v50, 4 }
 0x225   : > { %v4952_v57 = vrot.slane %v2844_v59, %v4602_v17  ;;  %v4955_v23 = vrot.slane %v2845_v9, %v4602_v17  ;;  %v2209_v21 = vrot.slane %v2064_v4, 2  ;;  %v2353_v33 = vrot.slane %v2064_v4, 4 }
 0x226   : > { %v4958_v1 = vsel %vm2948_vm5, %v2995_v30, %v2994_v10  ;;  %v3023_v8 = vrot.slane %v2706_v6, 6  ;;  %v3051_v26 = vrot.slane %v2722_v0, 6  ;;  %v2149_v11 = vadd.f32 %v2148_v35, %v2147_v50 }
 0x227   : > { %v2307_v55 = vsel %vm2069_vm3, %v2209_v21, 0.0  ;;  %v2451_v15 = vsel %vm2069_vm3, %v2353_v33, 0.0  ;;  %v2497_v48 = vrot.slane %v2064_v4, 6  ;;  %v2643_v18 = vrot.slane %v4590_v29, 3 }
 0x228   : > { %v4966_v43 = vsel %vm2948_vm5, %v3023_v8, %v3022_v46  ;;  %v4969_v12 = vsel %vm2948_vm5, %v3051_v26, %v3050_v22  ;;  %v2150_v20 = vrot.slane %v2149_v11, 2  ;;  %v2308_v41 = vrot.slane %v2307_v55, 4 }
 0x229   : > { %v2452_v49 = vrot.slane %v2451_v15, 4  ;;  %v2595_v7 = vsel %vm2069_vm3, %v2497_v48, 0.0  ;;  %v2065_v53 = vmul.f32 %v2049_v27, %v4745_v51  ;;  %v4974_v16 = vrot.slane %v4590_v29, 4 }
 0x22a   : > { %v2151_v24 = vadd.f32 %v2150_v20, %v2149_v11  ;;  %v2309_v54 = vadd.f32 %v2308_v41, %v2307_v55  ;;  %v2596_v19 = vrot.slane %v2595_v7, 4  ;;  %v4977_v60 = vmul.f32 %v2050_v25, %v4753_v58 }
 0x22b   : > { %v2453_v56 = vadd.f32 %v2452_v49, %v2451_v15  ;;  %v2154_v32 = vsel %vm2069_vm3, %v2065_v53, 0.0  ;;  %v2210_v42 = vrot.slane %v2065_v53, 2  ;;  %v2354_v40 = vrot.slane %v2065_v53, 4 }
 0x22c   : > { %v2152_v3 = vrot.slane %v2151_v24, 1  ;;  %v2310_v5 = vrot.slane %v2309_v54, 2  ;;  %v2597_v37 = vadd.f32 %v2596_v19, %v2595_v7  ;;  %v2155_v44 = vrot.slane %v2154_v32, 4 }
 0x22d   : > { %v2454_v10 = vrot.slane %v2453_v56, 2  ;;  %v2314_v51 = vsel %vm2069_vm3, %v2210_v42, 0.0  ;;  %v2458_v61 = vsel %vm2069_vm3, %v2354_v40, 0.0  ;;  %v2498_v31 = vrot.slane %v2065_v53, 6 }
 0x22e   : > { %v2153_v28 = vadd.f32 %v2152_v3, %v2151_v24  ;;  %v2311_v63 = vadd.f32 %v2310_v5, %v2309_v54  ;;  %v2598_v14 = vrot.slane %v2597_v37, 2  ;;  %v2156_v58 = vadd.f32 %v2155_v44, %v2154_v32 }
 0x22f   : > { %v2455_v45 = vadd.f32 %v2454_v10, %v2453_v56  ;;  %v2315_v36 = vrot.slane %v2314_v51, 4  ;;  %v2459_v46 = vrot.slane %v2458_v61, 4  ;;  %v2602_v39 = vsel %vm2069_vm3, %v2498_v31, 0.0 }
 0x230   : > { %v2312_v38 = vrot.slane %v2311_v63, 1  ;;  %v2599_v4 = vadd.f32 %v2598_v14, %v2597_v37  ;;  %v2675_v22 = vmul.f32 %v2643_v18, %v2153_v28  ;;  %v2157_v47 = vrot.slane %v2156_v58, 2 }
 0x231   : > { %v2456_v2 = vrot.slane %v2455_v45, 1  ;;  %v2316_v62 = vadd.f32 %v2315_v36, %v2314_v51  ;;  %v2460_v59 = vadd.f32 %v2459_v46, %v2458_v61  ;;  %v2603_v9 = vrot.slane %v2602_v39, 4 }
 0x232   : > { %v2313_v50 = vadd.f32 %v2312_v38, %v2311_v63  ;;  %v2600_v6 = vrot.slane %v2599_v4, 1  ;;  %v2969_v0 = vrot.slane %v2675_v22, 5  ;;  %v2158_v30 = vadd.f32 %v2157_v47, %v2156_v58 }
 0x233   : > { %v2457_v35 = vadd.f32 %v2456_v2, %v2455_v45  ;;  %v2317_v21 = vrot.slane %v2316_v62, 2  ;;  %v2461_v33 = vrot.slane %v2460_v59, 2  ;;  %v2604_v8 = vadd.f32 %v2603_v9, %v2602_v39  ;;  %v2051_v2 = vld [vmem:[%s4368_s14 + $0x70] sm:$0xff] }
 0x234   : > { %v2601_v26 = vadd.f32 %v2600_v6, %v2599_v4  ;;  %v2691_v11 = vmul.f32 %v2643_v18, %v2313_v50  ;;  %v2970_v27 = vsel %vm2951_vm6, %v2969_v0, %v4944_v13  ;;  %v2159_v55 = vrot.slane %v2158_v30, 1  ;;  %v5199_v0 = vld [vmem:[#allocation26_spill] sm:$0xff] }
 0x235   : > { %v2707_v15 = vmul.f32 %v2643_v18, %v2457_v35  ;;  %v2318_v48 = vadd.f32 %v2317_v21, %v2316_v62  ;;  %v2462_v25 = vadd.f32 %v2461_v33, %v2460_v59  ;;  %v2605_v20 = vrot.slane %v2604_v8, 2  ;;  %v5200_v33 = vld [vmem:[#allocation28_spill] sm:$0xff] }
 0x236   : > { %v2723_v41 = vmul.f32 %v2643_v18, %v2601_v26  ;;  %v2997_v49 = vrot.slane %v2691_v11, 5  ;;  %v2160_v7 = vadd.f32 %v2159_v55, %v2158_v30  ;;  %v2161_v53 = vsel %vm2069_vm3, %v4977_v60, 0.0 }
 0x237   : > { %v3025_v24 = vrot.slane %v2707_v15, 5  ;;  %v2319_v54 = vrot.slane %v2318_v48, 1  ;;  %v2463_v19 = vrot.slane %v2462_v25, 1  ;;  %v2606_v56 = vadd.f32 %v2605_v20, %v2604_v8 }
 0x238   : > { %v2998_v32 = vsel %vm2951_vm6, %v2997_v49, %v4958_v1  ;;  %v3053_v42 = vrot.slane %v2723_v41, 5  ;;  %v2676_v13 = vmul.f32 %v4974_v16, %v2160_v7  ;;  %v2162_v40 = vrot.slane %v2161_v53, 4 }
 0x239   : > { %v3026_v3 = vsel %vm2951_vm6, %v3025_v24, %v4966_v43  ;;  %v2320_v18 = vadd.f32 %v2319_v54, %v2318_v48  ;;  %v2464_v5 = vadd.f32 %v2463_v19, %v2462_v25  ;;  %v2607_v37 = vrot.slane %v2606_v56, 1 }
 0x23a   : > { %v3054_v44 = vsel %vm2951_vm6, %v3053_v42, %v4969_v12  ;;  %v2971_v10 = vrot.slane %v2676_v13, 4  ;;  %v2163_v51 = vadd.f32 %v2162_v40, %v2161_v53  ;;  %v2211_v61 = vrot.slane %v4977_v60, 2 }
 0x23b   : > { %v2608_v31 = vadd.f32 %v2607_v37, %v2606_v56  ;;  %v2692_v1 = vmul.f32 %v4974_v16, %v2320_v18  ;;  %v2708_v28 = vmul.f32 %v4974_v16, %v2464_v5  ;;  %v2355_v63 = vrot.slane %v4977_v60, 4 }
 0x23c   : > { %v2972_v43 = vsel %vm2954_vm7, %v2971_v10, %v2970_v27  ;;  %v2164_v14 = vrot.slane %v2163_v51, 2  ;;  %v2321_v58 = vsel %vm2069_vm3, %v2211_v61, 0.0  ;;  %v2499_v45 = vrot.slane %v4977_v60, 6 }
 0x23d   : > { %v2724_v12 = vmul.f32 %v4974_v16, %v2608_v31  ;;  %v2999_v36 = vrot.slane %v2692_v1, 4  ;;  %v3027_v46 = vrot.slane %v2708_v28, 4  ;;  %v2322_v39 = vrot.slane %v2321_v58, 4 }
 0x23e   : > { %v2165_v38 = vadd.f32 %v2164_v14, %v2163_v51  ;;  %v2465_v4 = vsel %vm2069_vm3, %v2355_v63, 0.0  ;;  %v2609_v22 = vsel %vm2069_vm3, %v2499_v45, 0.0  ;;  %v2645_v47 = vrot.slane %v4590_v29, 5 }
 0x23f   : > { %v3000_v62 = vsel %vm2954_vm7, %v2999_v36, %v2998_v32  ;;  %v5008_v59 = vsel %vm2954_vm7, %v3027_v46, %v3026_v3  ;;  %v3055_v9 = vrot.slane %v2724_v12, 4  ;;  %v2323_v60 = vadd.f32 %v2322_v39, %v2321_v58  ;;  %v5201_v12 = vld [vmem:[#allocation29_spill] sm:$0xff]  ;;  %v5202_v36 = vld [vmem:[#allocation27_spill] sm:$0xff] }
 0x240   : > { %v2166_v50 = vrot.slane %v2165_v38, 1  ;;  %v2466_v16 = vrot.slane %v2465_v4, 4  ;;  %v2610_v6 = vrot.slane %v2609_v22, 4  ;;  %v2828_v30 = vcombine.low %v5199_v0, %v4755_v52 }
 0x241   : > { %v5013_v35 = vsel %vm2954_vm7, %v3055_v9, %v3054_v44  ;;  %v2324_v21 = vrot.slane %v2323_v60, 2  ;;  %v2067_v8 = vmul.f32 %v2051_v2, %v5200_v33  ;;  %v5017_v26 = vrot.slane %v4590_v29, 6 }
 0x242   : > { %v2167_v11 = vadd.f32 %v2166_v50, %v2165_v38  ;;  %v2467_v27 = vadd.f32 %v2466_v16, %v2465_v4  ;;  %v2611_v55 = vadd.f32 %v2610_v6, %v2609_v22  ;;  %v2835_v15 = vrot.slane %v2828_v30, %v4599_v34 }
 0x243   : > { %v2325_v48 = vadd.f32 %v2324_v21, %v2323_v60  ;;  %v2168_v25 = vsel %vm2069_vm3, %v2067_v8, 0.0  ;;  %v2212_v20 = vrot.slane %v2067_v8, 2  ;;  %v2356_v41 = vrot.slane %v2067_v8, 4 }
 0x244   : > { %v2468_v52 = vrot.slane %v2467_v27, 2  ;;  %v2612_v49 = vrot.slane %v2611_v55, 2  ;;  %v2677_v7 = vmul.f32 %v2645_v47, %v2167_v11  ;;  %v2169_v53 = vrot.slane %v2168_v25, 4 }
 0x245   : > { %v2326_v24 = vrot.slane %v2325_v48, 1  ;;  %v2328_v54 = vsel %vm2069_vm3, %v2212_v20, 0.0  ;;  %v2472_v19 = vsel %vm2069_vm3, %v2356_v41, 0.0  ;;  %v2500_v56 = vrot.slane %v2067_v8, 6 }
 0x246   : > { %v2469_v32 = vadd.f32 %v2468_v52, %v2467_v27  ;;  %v2613_v42 = vadd.f32 %v2612_v49, %v2611_v55  ;;  %v2973_v13 = vrot.slane %v2677_v7, 3  ;;  %v2170_v40 = vadd.f32 %v2169_v53, %v2168_v25  ;;  %v2052_v25 = vld [vmem:[%s4368_s14 + $0x78] sm:$0xff] }
 0x247   : > { %v2327_v3 = vadd.f32 %v2326_v24, %v2325_v48  ;;  %v2329_v18 = vrot.slane %v2328_v54, 4  ;;  %v2473_v5 = vrot.slane %v2472_v19, 4  ;;  %v2616_v37 = vsel %vm2069_vm3, %v2500_v56, 0.0  ;;  %v5203_v24 = vld [vmem:[#allocation30_spill] sm:$0xff] }
 0x248   : > { %v2470_v44 = vrot.slane %v2469_v32, 1  ;;  %v2614_v10 = vrot.slane %v2613_v42, 1  ;;  %v2974_v51 = vsel %vm2957_vm8, %v2973_v13, %v2972_v43  ;;  %v2171_v61 = vrot.slane %v2170_v40, 2 }
 0x249   : > { %v2693_v31 = vmul.f32 %v2645_v47, %v2327_v3  ;;  %v2330_v1 = vadd.f32 %v2329_v18, %v2328_v54  ;;  %v2474_v28 = vadd.f32 %v2473_v5, %v2472_v19  ;;  %v2617_v63 = vrot.slane %v2616_v37, 4 }
 0x24a   : > { %v2471_v14 = vadd.f32 %v2470_v44, %v2469_v32  ;;  %v2615_v58 = vadd.f32 %v2614_v10, %v2613_v42  ;;  %v2172_v45 = vadd.f32 %v2171_v61, %v2170_v40  ;;  %v2836_v46 = vcombine.low %v5202_v36, %v5201_v12 }
 0x24b   : > { %v3001_v39 = vrot.slane %v2693_v31, 3  ;;  %v2331_v38 = vrot.slane %v2330_v1, 2  ;;  %v2475_v4 = vrot.slane %v2474_v28, 2  ;;  %v2618_v22 = vadd.f32 %v2617_v63, %v2616_v37 }
 0x24c   : > { %v2709_v2 = vmul.f32 %v2645_v47, %v2471_v14  ;;  %v2725_v9 = vmul.f32 %v2645_v47, %v2615_v58  ;;  %v2173_v60 = vrot.slane %v2172_v45, 1  ;;  %v2843_v43 = vrot.slane %v2836_v46, %v4599_v34 }
 0x24d   : > { %v3002_v50 = vsel %vm2957_vm8, %v3001_v39, %v3000_v62  ;;  %v2332_v16 = vadd.f32 %v2331_v38, %v2330_v1  ;;  %v2476_v6 = vadd.f32 %v2475_v4, %v2474_v28  ;;  %v2619_v0 = vrot.slane %v2618_v22, 2 }
 0x24e   : > { %v3029_v30 = vrot.slane %v2709_v2, 3  ;;  %v3057_v21 = vrot.slane %v2725_v9, 3  ;;  %v2174_v33 = vadd.f32 %v2173_v60, %v2172_v45  ;;  %v2860_v8 = vcombine.low %v2835_v15, %v2843_v43 }
 0x24f   : > { %v2333_v11 = vrot.slane %v2332_v16, 1  ;;  %v2477_v27 = vrot.slane %v2476_v6, 1  ;;  %v2620_v55 = vadd.f32 %v2619_v0, %v2618_v22  ;;  %v2861_v48 = vcombine.high %v2835_v15, %v2843_v43 }
 0x250   : > { %v3030_v47 = vsel %vm2957_vm8, %v3029_v30, %v5008_v59  ;;  %v3058_v34 = vsel %vm2957_vm8, %v3057_v21, %v5013_v35  ;;  %v2678_v62 = vmul.f32 %v5017_v26, %v2174_v33  ;;  %v2868_v20 = vrot.slane %v2860_v8, %v4602_v17 }
 0x251   : > { %v2334_v41 = vadd.f32 %v2333_v11, %v2332_v16  ;;  %v2478_v52 = vadd.f32 %v2477_v27, %v2476_v6  ;;  %v2621_v49 = vrot.slane %v2620_v55, 1  ;;  %v2875_v7 = vrot.slane %v2861_v48, %v4602_v17 }
 0x252   : > { %v2975_v53 = vrot.slane %v2678_v62, 2  ;;  %v2876_v15 = vcombine.low %v4952_v57, %v2868_v20  ;;  %v2877_v59 = vcombine.high %v4952_v57, %v2868_v20  ;;  %v2068_v54 = vmul.f32 %v2052_v25, %v5203_v24 }
 0x253   : > { %v2622_v35 = vadd.f32 %v2621_v49, %v2620_v55  ;;  %v2694_v19 = vmul.f32 %v5017_v26, %v2334_v41  ;;  %v2710_v56 = vmul.f32 %v5017_v26, %v2478_v52  ;;  %v2878_v32 = vcombine.low %v4955_v23, %v2875_v7 }
 0x254   : > { %v2976_v42 = vsel %vm2960_vm9, %v2975_v53, %v2974_v51  ;;  %v2879_v17 = vcombine.high %v4955_v23, %v2875_v7  ;;  %3381 = vst.msk [vmem:[%s4419_s11 + $0x88] sm:$0xff] %vm740_vm0, %v2876_v15  ;;  %3383 = vst.msk [vmem:[%s4419_s11 + $0x98] sm:$0xff] %vm740_vm0, %v2877_v59  ;;  %v2175_v57 = vsel %vm2069_vm3, %v2068_v54, 0.0  ;;  %v2213_v13 = vrot.slane %v2068_v54, 2 }
 0x255   : > { %v2726_v40 = vmul.f32 %v5017_v26, %v2622_v35  ;;  %v3003_v3 = vrot.slane %v2694_v19, 2  ;;  %v3031_v18 = vrot.slane %v2710_v56, 2  ;;  %3385 = vst.msk [vmem:[%s4419_s11 + $0xa8] sm:$0xff] %vm740_vm0, %v2878_v32  ;;  %v2176_v5 = vrot.slane %v2175_v57, 4 }
 0x256   : > { %3387 = vst.msk [vmem:[%s4419_s11 + $0xb8] sm:$0xff] %vm740_vm0, %v2879_v17  ;;  %v2335_v37 = vsel %vm2069_vm3, %v2213_v13, 0.0  ;;  %v2357_v44 = vrot.slane %v2068_v54, 4  ;;  %v2501_v23 = vrot.slane %v2068_v54, 6  ;;  %v2647_v9 = vrot.slane %v4590_v29, 7 }
 0x257   : > { %v3004_v10 = vsel %vm2960_vm9, %v3003_v3, %v3002_v50  ;;  %v3032_v51 = vsel %vm2960_vm9, %v3031_v18, %v3030_v47  ;;  %v3059_v61 = vrot.slane %v2726_v40, 2  ;;  %v2177_v31 = vadd.f32 %v2176_v5, %v2175_v57 }
 0x258   : > { %v2336_v1 = vrot.slane %v2335_v37, 4  ;;  %v2479_v26 = vsel %vm2069_vm3, %v2357_v44, 0.0  ;;  %v2623_v28 = vsel %vm2069_vm3, %v2501_v23, 0.0 }
 0x259   : > { %v3060_v63 = vsel %vm2960_vm9, %v3059_v61, %v3058_v34  ;;  %v2178_v14 = vrot.slane %v2177_v31, 2  ;;  %v2480_v58 = vrot.slane %v2479_v26, 4  ;;  %v2624_v45 = vrot.slane %v2623_v28, 4 }
 0x25a   : > { %v2337_v12 = vadd.f32 %v2336_v1, %v2335_v37 }
 0x25b   : > { %v2179_v36 = vadd.f32 %v2178_v14, %v2177_v31  ;;  %v2481_v46 = vadd.f32 %v2480_v58, %v2479_v26  ;;  %v2625_v39 = vadd.f32 %v2624_v45, %v2623_v28 }
 0x25c   : > { %v2338_v38 = vrot.slane %v2337_v12, 2 }
 0x25d   : > { %v2180_v4 = vrot.slane %v2179_v36, 1  ;;  %v2482_v22 = vrot.slane %v2481_v46, 2  ;;  %v2626_v2 = vrot.slane %v2625_v39, 2 }
 0x25e   : > { %v2339_v60 = vadd.f32 %v2338_v38, %v2337_v12 }
 0x25f   : > { %v2181_v43 = vadd.f32 %v2180_v4, %v2179_v36  ;;  %v2483_v50 = vadd.f32 %v2482_v22, %v2481_v46  ;;  %v2627_v16 = vadd.f32 %v2626_v2, %v2625_v39 }
 0x260   : > { %v2340_v6 = vrot.slane %v2339_v60, 1 }
 0x261   : > { %v2484_v0 = vrot.slane %v2483_v50, 1  ;;  %v2628_v30 = vrot.slane %v2627_v16, 1  ;;  %v2679_v21 = vmul.f32 %v2647_v9, %v2181_v43 }
 0x262   : > { %v2341_v33 = vadd.f32 %v2340_v6, %v2339_v60 }
 0x263   : > { %v2485_v8 = vadd.f32 %v2484_v0, %v2483_v50  ;;  %v2629_v11 = vadd.f32 %v2628_v30, %v2627_v16  ;;  %v2977_v27 = vrot.slane %v2679_v21, 1 }
 0x264   : > { %v2695_v55 = vmul.f32 %v2647_v9, %v2341_v33 }
 0x265   : > { %v2711_v48 = vmul.f32 %v2647_v9, %v2485_v8  ;;  %v2727_v29 = vmul.f32 %v2647_v9, %v2629_v11  ;;  %v2978_v25 = vsel %vm2963_vm10, %v2977_v27, %v2976_v42 }
 0x266   : > { %v3005_v47 = vrot.slane %v2695_v55, 1  ;;  %3072 = vst.msk [vmem:[%s4419_s11 + $0x8] sm:$0xff] %vm740_vm0, %v2978_v25 }
 0x267   : > { %v3033_v34 = vrot.slane %v2711_v48, 1  ;;  %v3061_v62 = vrot.slane %v2727_v29, 1 }
 0x268   : > { %v3006_v20 = vsel %vm2963_vm10, %v3005_v47, %v3004_v10 }
 0x269   : > { %v3034_v41 = vsel %vm2963_vm10, %v3033_v34, %v3032_v51  ;;  %v3062_v52 = vsel %vm2963_vm10, %v3061_v62, %v3060_v63  ;;  %3074 = vst.msk [vmem:[%s4419_s11 + $0x18] sm:$0xff] %vm740_vm0, %v3006_v20 }
 0x26a   : > { %3076 = vst.msk [vmem:[%s4419_s11 + $0x28] sm:$0xff] %vm740_vm0, %v3034_v41  ;;  %3078 = vst.msk [vmem:[%s4419_s11 + $0x38] sm:$0xff] %vm740_vm0, %v3062_v52 }
 0x26b   : > { %s5204_s9 = sld [smem:[#allocation18_spill]]  ;;  %s5205_s10 = sld [smem:[#allocation19_spill]] }
 0x26c   : > { %s5206_s28 = sld [smem:[#allocation24_spill]]  ;;  %s3131_s5 = sshll.u32 %s4419_s11, 4  ;;  %s3132_s5 = int_to_ptr.vmem [resolvable:$true] %s3131_s5 }
 0x26d   : > { %s4007_s29 = smov 256   ;;  %s5208_s15 = sld [smem:[#allocation32_spill]] }
 0x26e   : > { %s4008_s4 = smov 2048   ;;  %s4009_s12 = smov 2  }
 0x26f   : > { %s4010_s16 = smov 128   ;;  %s4011_s27 = smov 8  }
 0x270   : > { %s4012_s11 = smov [#allocation11]  }
 0x271   : > { %s3388_s30 = sshll.u32 %s5204_s9, 1  ;;  %s3636_s26 = smul.u32 192, %s5205_s10 }
 0x272   : > { %p5207_p11 = scmp.ne.s32.totalorder %s5206_s28, 0  ;;  %s4013_s9 = smov 0  }
 0x273   : > { %s3112_s8 = sadd.s32 %s3636_s26, %s3388_s30 }
 0x274   : > { %s3389_s21 = sshll.u32 %s3112_s8, 7  ;;  %3645 = sst [smem:[#allocation12]] (%p5207_p11), %s4007_s29 }
 0x275   : > { %s3114_s1 = scalar_lea.hbm %s5208_s15, %s3389_s21  ;;  %3646 = sst [smem:[#allocation12 + $0x1]] (%p5207_p11), %s4008_s4 }
 0x276   : > { %3647 = sst [smem:[#allocation12 + $0x2]] (%p5207_p11), %s4009_s12 }
 0x277   : > { %3648 = sst [smem:[#allocation12 + $0x3]] (%p5207_p11), %s4010_s16 }
 0x278   : > { %3649 = sst [smem:[#allocation12 + $0x4]] (%p5207_p11), %s4010_s16 }
 0x279   : > { %3650 = sst [smem:[#allocation12 + $0x5]] (%p5207_p11), %s4011_s27 }
 0x27a   : > { %3651 = dma.general (%p5207_p11), %s3132_s5, 3072, %s3114_s1, %s3098_s6, %s4012_s11, [#allocation12], %s4013_s9, 0  }
 0x27b PF: > { %p3671_p10 = scmp.ge.s32.totalorder %s3995_s25, 2  ;;  %s3159_s10 = sand.u32 1, %s3967_s18  }
 0x27c   : > { %p5209_p7 = scmp.ne.s32.totalorder %s5182_s7, 0  ;;  %s3160_s30 = scalar_lea.sflag [#allocation4], %s3159_s10 }
 0x27e   : > { %p3667_p6 = pnand %p3671_p10, %p5209_p7 }
 0x280   : > { %3950 = dma.done.wait (!%p3667_p6), %s3160_s30, 3072  }
 0x281   : > { %3952 = vsyncadd (!%p3667_p6), %s3160_s30, 4294964224  ;;  %s26_s25 = sadd.s32 1, %s3995_s25   ;;  %s5210_s15 = sld [smem:[#allocation17_spill]] }
 0x282   : > { %p23_p5 = scmp.ge.s32.totalorder %s26_s25, 18   ;;  %s5211_s6 = sld [smem:[#allocation25_spill]] }
 0x283   : > { %s5212_s28 = sld [smem:[#allocation21_spill]]  ;;  %s5213_s26 = sld [smem:[#allocation22_spill]] }
 0x284   : > { %s5214_s16 = smov %s3963_s17  ;;  %s5215_s17 = smov %s4220_s22 }
 0x285   : > { %s5216_s18 = smov %s3971_s19  ;;  %s5217_s19 = smov %s3975_s20 }
 0x286   : > { %s5219_s21 = smov %s3987_s23  ;;  %s5220_s22 = smov %s3991_s24 }
 0x287   :  { %25 = sbr.rel (!%p23_p5) target bundleno = 16 (0x10), region = 125 }
 0x288   : > { %s5218_s20 = smov %s5211_s6 }
 0x289   : > { %s5221_s23 = smov %s5212_s28  ;;  %s5222_s24 = smov %s5213_s26 }
 0x28e   :  { %3165 = vsyncpa [#allocation3], 1 }
 0x28f   :  { %3167 = vsyncpa [#allocation3 + $0x1], 1 }
 0x290   :  { %3168 = vsyncpa [#allocation6], 1 }
 0x291   :  { %3170 = vsyncpa [#allocation6 + $0x1], 1 }
 0x292   :  { %3171 = vsyncpa [#allocation9], 1 }
 0x293   :  { %3173 = vsyncpa [#allocation9 + $0x1], 1 }
 0x294   :  { %3174 = vsyncpa [#allocation4], 1 }
 0x295   :  { %3176 = vsyncpa [#allocation4 + $0x1], 1 }

</bundles_post_ra>
